<compile_context>
chip_gen: v7x
topology: tpu7x:2x2x1
jax: 0.10.0
libtpu: 0.0.40
codegen_flags: <defaults>
</compile_context>

<pallas_src>
import functools

import jax
import jax.numpy as jnp
from jax.experimental import pallas as pl
from jax.experimental.pallas import tpu as pltpu

_HI = jax.lax.Precision.HIGHEST  # keep f32 accuracy on the (tiny) matmuls


def _fast_recip(d):
    """EUP approx reciprocal + 2 Newton-Raphson steps (~f32 accurate, no divide)."""
    r = pl.reciprocal(d, approx=True)
    r = r * (2.0 - d * r)
    r = r * (2.0 - d * r)
    return r


def gumbel_softmax_kernel(x_ref, w_ref, b_ref, eps_ref, seg_ref, mean_ref,
                          sample_ref, probs_ref, *, inv_tau):
    """One batch tile, everything in lane-dense (TB, H) layout."""
    x = x_ref[...]                                   # (TB, F)
    w = w_ref[...]                                   # (F, H)
    seg = seg_ref[...]                               # (H, H) block-diagonal ones

    # ---- Linear layer (MXU) ----
    logits = jnp.dot(x, w, preferred_element_type=jnp.float32,
                     precision=_HI) + b_ref[...]     # (TB, H)

    # ---- categorical softmax over each contiguous group of n_dist lanes ----
    # Subtract the per-row max: it is a shared constant per row, so it cancels
    # exactly in every group's exp/sum ratio while keeping exp() in range.
    m = jnp.max(logits, axis=-1, keepdims=True)
    e = jnp.exp(logits - m)                          # full-width EUP
    denom = jnp.dot(e, seg, preferred_element_type=jnp.float32,
                    precision=_HI)                   # per-group sums, broadcast to lanes
    probs_ref[...] = e * _fast_recip(denom)          # lane-dense (TB, H) store

    # ---- Gumbel-Softmax reparametrization ----
    eps = eps_ref[...]                               # (TB, H) lane-dense
    gumbel = -jnp.log(-jnp.log(eps + 1e-8) + 1e-8)
    yl = logits + gumbel
    if inv_tau != 1.0:                               # trace-time constant fold
        yl = yl * inv_tau
    m2 = jnp.max(yl, axis=-1, keepdims=True)
    e2 = jnp.exp(yl - m2)
    d2 = jnp.dot(e2, seg, preferred_element_type=jnp.float32, precision=_HI)
    y = e2 * _fast_recip(d2)                         # (TB, H)

    # ---- torch .view(-1, n_dist, out_feat).mean(dim=1) as one small matmul ----
    # sample[b, f] = (1/n_dist) * sum_d y[b, d*out_feat + f]
    sample_ref[...] = jnp.dot(y, mean_ref[...],
                              preferred_element_type=jnp.float32, precision=_HI)


def gumbel_softmax_forward(x, w_t, b, eps, *, out_features, n_distributions,
                           tau=1.0, block_batch=None):
    B, F = x.shape
    H = out_features * n_distributions
    assert w_t.shape == (F, H) and b.shape == (1, H) and eps.shape == (B, H)

    if block_batch is None:
        block_batch = min(B, 256)
    TB = block_batch
    assert TB == B or TB % 8 == 0, "batch tile must be a multiple of 8 (or all of B)"

    # Block-diagonal ones: column groups of n_distributions.  e @ seg broadcasts
    # each group's sum back onto every lane of that group.
    grp = jnp.arange(H, dtype=jnp.int32) // n_distributions
    seg = (grp[:, None] == grp[None, :]).astype(jnp.float32)            # (H, H)

    # Averaging matrix for the .view(-1, n_dist, out_feat).mean(1) regrouping.
    col = jnp.arange(H, dtype=jnp.int32) % out_features
    mean_mat = (col[:, None] ==
                jnp.arange(out_features, dtype=jnp.int32)[None, :]).astype(jnp.float32)
    mean_mat = mean_mat / float(n_distributions)                        # (H, out_feat)

    kernel = functools.partial(gumbel_softmax_kernel, inv_tau=float(1.0 / tau))

    sample, probs2d = pl.pallas_call(
        kernel,
        grid=(pl.cdiv(B, TB),),
        in_specs=[
            pl.BlockSpec((TB, F), lambda i: (i, 0)),            # x: streamed per tile
            pl.BlockSpec((F, H), lambda i: (0, 0)),             # W^T: VMEM-resident
            pl.BlockSpec((1, H), lambda i: (0, 0)),             # bias
            pl.BlockSpec((TB, H), lambda i: (i, 0)),            # eps: streamed per tile
            pl.BlockSpec((H, H), lambda i: (0, 0)),             # seg-sum matrix
            pl.BlockSpec((H, out_features), lambda i: (0, 0)),  # mean matrix
        ],
        out_specs=(
            pl.BlockSpec((TB, out_features), lambda i: (i, 0)),
            pl.BlockSpec((TB, H), lambda i: (i, 0)),            # lane-dense probs slab
        ),
        out_shape=(
            jax.ShapeDtypeStruct((B, out_features), jnp.float32),
            jax.ShapeDtypeStruct((B, H), jnp.float32),
        ),
        compiler_params=pltpu.CompilerParams(
            dimension_semantics=("parallel",)),
    )(x, w_t, b, eps, seg, mean_mat)

    # Free row-major view to match torch's .view(-1, n_distributions).
    probs = probs2d.reshape(B * out_features, n_distributions)
    return sample, probs


def reference_forward(x, w_t, b, eps, *, out_features, n_distributions, tau=1.0):
    """Pure-JAX reference with identical math (for correctness checking)."""
    logits2d = jnp.dot(x, w_t, precision=_HI) + b
    logits = logits2d.reshape(-1, n_distributions)
    probs = jax.nn.softmax(logits, axis=-1)
    g = -jnp.log(-jnp.log(eps.reshape(-1, n_distributions) + 1e-8) + 1e-8)
    y = jax.nn.softmax((logits + g) / tau, axis=-1)
    sample = y.reshape(-1, n_distributions, out_features).mean(axis=1)
    return sample, probs


if __name__ == "__main__":
    # Small, module-consistent shapes; B=16 with TB=8 exercises a 2-step grid.
    B = 16
    in_features = 32
    out_features = 16
    n_distributions = 8
    tau = 1.0
    H = out_features * n_distributions

    key = jax.random.PRNGKey(0)
    kx, kw, kb, ke = jax.random.split(key, 4)

    # Deterministic nn.Linear-style init: U(-1/sqrt(in), 1/sqrt(in)).
    bound = 1.0 / (in_features ** 0.5)
    x = jax.random.normal(kx, (B, in_features), dtype=jnp.float32)
    w_t = jax.random.uniform(kw, (in_features, H), dtype=jnp.float32,
                             minval=-bound, maxval=bound)
    b = jax.random.uniform(kb, (1, H), dtype=jnp.float32,
                           minval=-bound, maxval=bound)
    # torch.rand -> U[0, 1) noise, generated deterministically in-script.
    eps = jax.random.uniform(ke, (B, H), dtype=jnp.float32)

    sample, probs = gumbel_softmax_forward(
        x, w_t, b, eps,
        out_features=out_features, n_distributions=n_distributions,
        tau=tau, block_batch=8)
    jax.block_until_ready((sample, probs))

    ref_sample, ref_probs = reference_forward(
        x, w_t, b, eps,
        out_features=out_features, n_distributions=n_distributions, tau=tau)

    assert sample.shape == (B, out_features)
    assert probs.shape == (B * out_features, n_distributions)
    assert jnp.allclose(sample, ref_sample, rtol=1e-5, atol=1e-5)
    assert jnp.allclose(probs, ref_probs, rtol=1e-5, atol=1e-5)

    print("KERNEL_OK")
</pallas_src>

<mosaic_0001>
module attributes {stable_mosaic.version = 11 : i64} {
  func.func @gumbel_softmax_kernel(%arg0: i32, %arg1: memref<8x32xf32, #tpu.memory_space<vmem>>, %arg2: memref<32x128xf32, #tpu.memory_space<vmem>>, %arg3: memref<1x128xf32, #tpu.memory_space<vmem>>, %arg4: memref<8x128xf32, #tpu.memory_space<vmem>>, %arg5: memref<128x128xf32, #tpu.memory_space<vmem>>, %arg6: memref<128x16xf32, #tpu.memory_space<vmem>>, %arg7: memref<8x16xf32, #tpu.memory_space<vmem>>, %arg8: memref<8x128xf32, #tpu.memory_space<vmem>>) attributes {dimension_semantics = [#tpu.dimension_semantics<parallel>], iteration_bounds = array<i64: 2>, scalar_prefetch = 0 : i64, scratch_operands = 0 : i64, tpu.core_type = #tpu.core_type<tc>, window_params = [{transform_indices = @transform_0, window_bounds = array<i64: 8, 32>}, {pipeline_mode = #tpu.pipeline_mode<synchronous>, transform_indices = @transform_1, window_bounds = array<i64: 32, 128>}, {pipeline_mode = #tpu.pipeline_mode<synchronous>, transform_indices = @transform_2, window_bounds = array<i64: 1, 128>}, {transform_indices = @transform_3, window_bounds = array<i64: 8, 128>}, {pipeline_mode = #tpu.pipeline_mode<synchronous>, transform_indices = @transform_4, window_bounds = array<i64: 128, 128>}, {pipeline_mode = #tpu.pipeline_mode<synchronous>, transform_indices = @transform_5, window_bounds = array<i64: 128, 16>}, {transform_indices = @transform_6, window_bounds = array<i64: 8, 16>}, {transform_indices = @transform_7, window_bounds = array<i64: 8, 128>}]} {
    %c0 = arith.constant 0 : index
    %c0_0 = arith.constant 0 : index
    %0 = vector.load %arg1[%c0, %c0_0] : memref<8x32xf32, #tpu.memory_space<vmem>>, vector<8x32xf32>
    %c0_1 = arith.constant 0 : index
    %c0_2 = arith.constant 0 : index
    %1 = vector.load %arg2[%c0_1, %c0_2] : memref<32x128xf32, #tpu.memory_space<vmem>>, vector<32x128xf32>
    %c0_3 = arith.constant 0 : index
    %c0_4 = arith.constant 0 : index
    %2 = vector.load %arg5[%c0_3, %c0_4] : memref<128x128xf32, #tpu.memory_space<vmem>>, vector<128x128xf32>
    %cst = arith.constant dense<0.000000e+00> : vector<8x128xf32>
    %3 = tpu.matmul %0, %1, %cst {dimension_numbers = #tpu.dot_dimension_numbers<[1], [0], [0], [1], [0, 0, 1, 1], [], []>, precision = #tpu.contract_precision<fp32>} : vector<8x32xf32>, vector<32x128xf32>, vector<8x128xf32> -> vector<8x128xf32>
    %c0_5 = arith.constant 0 : index
    %c0_6 = arith.constant 0 : index
    %4 = vector.load %arg3[%c0_5, %c0_6] : memref<1x128xf32, #tpu.memory_space<vmem>>, vector<1x128xf32>
    %5 = vector.broadcast %4 : vector<1x128xf32> to vector<8x128xf32>
    %6 = arith.addf %3, %5 : vector<8x128xf32>
    %cst_7 = arith.constant dense<0xFF800000> : vector<8xf32>
    %7 = vector.multi_reduction <maximumf>, %6, %cst_7 [1] : vector<8x128xf32> to vector<8xf32>
    %8 = vector.shape_cast %7 : vector<8xf32> to vector<8x1xf32>
    %9 = vector.broadcast %8 : vector<8x1xf32> to vector<8x128xf32>
    %10 = arith.subf %6, %9 : vector<8x128xf32>
    %11 = math.exp %10 : vector<8x128xf32>
    %cst_8 = arith.constant dense<0.000000e+00> : vector<8x128xf32>
    %12 = tpu.matmul %11, %2, %cst_8 {dimension_numbers = #tpu.dot_dimension_numbers<[1], [0], [0], [1], [0, 0, 1, 1], [], []>, precision = #tpu.contract_precision<fp32>} : vector<8x128xf32>, vector<128x128xf32>, vector<8x128xf32> -> vector<8x128xf32>
    %13 = tpu.reciprocal %12 {approx = true} : vector<8x128xf32> -> vector<8x128xf32>
    %14 = arith.mulf %12, %13 : vector<8x128xf32>
    %cst_9 = arith.constant 2.000000e+00 : f32
    %15 = vector.broadcast %cst_9 : f32 to vector<8x128xf32>
    %16 = arith.subf %15, %14 : vector<8x128xf32>
    %17 = arith.mulf %13, %16 : vector<8x128xf32>
    %18 = arith.mulf %12, %17 : vector<8x128xf32>
    %cst_10 = arith.constant 2.000000e+00 : f32
    %19 = vector.broadcast %cst_10 : f32 to vector<8x128xf32>
    %20 = arith.subf %19, %18 : vector<8x128xf32>
    %21 = arith.mulf %17, %20 : vector<8x128xf32>
    %22 = arith.mulf %11, %21 : vector<8x128xf32>
    %c0_11 = arith.constant 0 : index
    %c0_12 = arith.constant 0 : index
    %23 = vector.load %arg8[%c0_11, %c0_12] : memref<8x128xf32, #tpu.memory_space<vmem>>, vector<8x128xf32>
    tpu.vector_store %arg8[%c0_11, %c0_12], %22 {strides = array<i32>} : memref<8x128xf32, #tpu.memory_space<vmem>>, vector<8x128xf32>,
    %c0_13 = arith.constant 0 : index
    %c0_14 = arith.constant 0 : index
    %24 = vector.load %arg4[%c0_13, %c0_14] : memref<8x128xf32, #tpu.memory_space<vmem>>, vector<8x128xf32>
    %cst_15 = arith.constant 9.99999993E-9 : f32
    %25 = vector.broadcast %cst_15 : f32 to vector<8x128xf32>
    %26 = arith.addf %24, %25 : vector<8x128xf32>
    %27 = math.log %26 : vector<8x128xf32>
    %cst_16 = arith.constant 0.000000e+00 : f32
    %28 = vector.broadcast %cst_16 : f32 to vector<8x128xf32>
    %29 = arith.subf %28, %27 : vector<8x128xf32>
    %cst_17 = arith.constant 9.99999993E-9 : f32
    %30 = vector.broadcast %cst_17 : f32 to vector<8x128xf32>
    %31 = arith.addf %29, %30 : vector<8x128xf32>
    %32 = math.log %31 : vector<8x128xf32>
    %cst_18 = arith.constant 0.000000e+00 : f32
    %33 = vector.broadcast %cst_18 : f32 to vector<8x128xf32>
    %34 = arith.subf %33, %32 : vector<8x128xf32>
    %35 = arith.addf %6, %34 : vector<8x128xf32>
    %cst_19 = arith.constant dense<0xFF800000> : vector<8xf32>
    %36 = vector.multi_reduction <maximumf>, %35, %cst_19 [1] : vector<8x128xf32> to vector<8xf32>
    %37 = vector.shape_cast %36 : vector<8xf32> to vector<8x1xf32>
    %38 = vector.broadcast %37 : vector<8x1xf32> to vector<8x128xf32>
    %39 = arith.subf %35, %38 : vector<8x128xf32>
    %40 = math.exp %39 : vector<8x128xf32>
    %cst_20 = arith.constant dense<0.000000e+00> : vector<8x128xf32>
    %41 = tpu.matmul %40, %2, %cst_20 {dimension_numbers = #tpu.dot_dimension_numbers<[1], [0], [0], [1], [0, 0, 1, 1], [], []>, precision = #tpu.contract_precision<fp32>} : vector<8x128xf32>, vector<128x128xf32>, vector<8x128xf32> -> vector<8x128xf32>
    %42 = tpu.reciprocal %41 {approx = true} : vector<8x128xf32> -> vector<8x128xf32>
    %43 = arith.mulf %41, %42 : vector<8x128xf32>
    %cst_21 = arith.constant 2.000000e+00 : f32
    %44 = vector.broadcast %cst_21 : f32 to vector<8x128xf32>
    %45 = arith.subf %44, %43 : vector<8x128xf32>
    %46 = arith.mulf %42, %45 : vector<8x128xf32>
    %47 = arith.mulf %41, %46 : vector<8x128xf32>
    %cst_22 = arith.constant 2.000000e+00 : f32
    %48 = vector.broadcast %cst_22 : f32 to vector<8x128xf32>
    %49 = arith.subf %48, %47 : vector<8x128xf32>
    %50 = arith.mulf %46, %49 : vector<8x128xf32>
    %51 = arith.mulf %40, %50 : vector<8x128xf32>
    %c0_23 = arith.constant 0 : index
    %c0_24 = arith.constant 0 : index
    %52 = vector.load %arg6[%c0_23, %c0_24] : memref<128x16xf32, #tpu.memory_space<vmem>>, vector<128x16xf32>
    %cst_25 = arith.constant dense<0.000000e+00> : vector<8x16xf32>
    %53 = tpu.matmul %51, %52, %cst_25 {dimension_numbers = #tpu.dot_dimension_numbers<[1], [0], [0], [1], [0, 0, 1, 1], [], []>, precision = #tpu.contract_precision<fp32>} : vector<8x128xf32>, vector<128x16xf32>, vector<8x16xf32> -> vector<8x16xf32>
    %c0_26 = arith.constant 0 : index
    %c0_27 = arith.constant 0 : index
    %54 = vector.load %arg7[%c0_26, %c0_27] : memref<8x16xf32, #tpu.memory_space<vmem>>, vector<8x16xf32>
    tpu.vector_store %arg7[%c0_26, %c0_27], %53 {strides = array<i32>} : memref<8x16xf32, #tpu.memory_space<vmem>>, vector<8x16xf32>,
    return
  }
  func.func @transform_0(%arg0: i32) -> (i32, i32) {
    %c0_i32 = arith.constant 0 : i32
    %c0_i32_0 = arith.constant 0 : i32
    return %arg0, %c0_i32 : i32, i32
  }
  func.func @transform_1(%arg0: i32) -> (i32, i32) {
    %c0_i32 = arith.constant 0 : i32
    %c0_i32_0 = arith.constant 0 : i32
    %c0_i32_1 = arith.constant 0 : i32
    return %c0_i32, %c0_i32_0 : i32, i32
  }
  func.func @transform_2(%arg0: i32) -> (i32, i32) {
    %c0_i32 = arith.constant 0 : i32
    %c0_i32_0 = arith.constant 0 : i32
    %c0_i32_1 = arith.constant 0 : i32
    return %c0_i32, %c0_i32_0 : i32, i32
  }
  func.func @transform_3(%arg0: i32) -> (i32, i32) {
    %c0_i32 = arith.constant 0 : i32
    %c0_i32_0 = arith.constant 0 : i32
    return %arg0, %c0_i32 : i32, i32
  }
  func.func @transform_4(%arg0: i32) -> (i32, i32) {
    %c0_i32 = arith.constant 0 : i32
    %c0_i32_0 = arith.constant 0 : i32
    %c0_i32_1 = arith.constant 0 : i32
    return %c0_i32, %c0_i32_0 : i32, i32
  }
  func.func @transform_5(%arg0: i32) -> (i32, i32) {
    %c0_i32 = arith.constant 0 : i32
    %c0_i32_0 = arith.constant 0 : i32
    %c0_i32_1 = arith.constant 0 : i32
    return %c0_i32, %c0_i32_0 : i32, i32
  }
  func.func @transform_6(%arg0: i32) -> (i32, i32) {
    %c0_i32 = arith.constant 0 : i32
    %c0_i32_0 = arith.constant 0 : i32
    return %arg0, %c0_i32 : i32, i32
  }
  func.func @transform_7(%arg0: i32) -> (i32, i32) {
    %c0_i32 = arith.constant 0 : i32
    %c0_i32_0 = arith.constant 0 : i32
    return %arg0, %c0_i32 : i32, i32
  }
}

</mosaic_0001>

<bundles_post_ra>
// kernel: tpu_custom_call.1
= control target key start
LH: loop header
LB: loop body
LE: loop exit
PB: predicated region body
PF: predicated region fallthrough
CT: control target
= control target key end

     0   :  { %13 = vsyncpa [#allocation3], 0  ;;  %s5864_s0 = inlined_call_operand.vmem [shape: f32[16,32], index: 0, kind: input, shape index: {}]   ;;  %s5865_s1 = inlined_call_operand.hbm [shape: f32[32,128], index: 1, kind: input, shape index: {}]   ;;  %s5866_s2 = inlined_call_operand.vmem [shape: f32[1,128], index: 2, kind: input, shape index: {}]   ;;  %s5867_s3 = inlined_call_operand.hbm [shape: f32[16,128], index: 3, kind: input, shape index: {}]   ;;  %s5868_s4 = inlined_call_operand.vmem [shape: f32[128,128], index: 4, kind: input, shape index: {}]   ;;  %s5869_s5 = inlined_call_operand.vmem [shape: f32[128,16], index: 5, kind: input, shape index: {}]   ;;  %s5870_s6 = inlined_call_operand.hbm [shape: f32[16,16], index: 6, kind: output, shape index: {0}]   ;;  %s5871_s7 = inlined_call_operand.hbm [shape: f32[16,128], index: 7, kind: output, shape index: {1}]  }
   0x1   :  { %14 = vsyncpa [#allocation6], 0 }
   0x2   :  { %16 = vsyncpa [#allocation6 + $0x1], 0 }
   0x3   :  { %17 = vsyncpa [#allocation4], 0 }
   0x4   :  { %19 = vsyncpa [#allocation4 + $0x1], 0 }
   0x5   :  { %20 = vsyncpa [#allocation9], 0 }
   0x6   :  { %22 = vsyncpa [#allocation9 + $0x1], 0  ;;  %s4839_s24 = smov 0   ;;  %s4841_s25 = smov 0  }
   0x7   :  { %s4843_s26 = smov 0   ;;  %s4845_s27 = smov 0  }
   0x8 LB: > { %s4860_s28 = sadd.s32 4294967295, %s4788_s27   ;;  %s2990_s29 = sadd.s32 4294967294, %s4788_s27   ;;  %s4788_s27 = sphi %s4845_s27, %s5911_s27   ;;  %s4784_s26 = sphi %s4843_s26, %s5910_s26   ;;  %s4780_s25 = sphi %s4841_s25, %s5909_s25   ;;  %s4776_s24 = sphi %s4839_s24, %s5908_s24  }
   0x9   : > { %p116_p0 = scmp.ne.s32.totalorder %s4780_s25, %s4776_s24  ;;  %p5872_p1 = scmp.eq.s32.totalorder %s4860_s28, 0 }
   0xa   : > { %p188_p3 = scmp.eq.s32.totalorder %s2990_s29, 1  ;;  %p2991_p5 = scmp.ge.s32.totalorder %s4788_s27, 1 }
   0xb   : > { %p4869_p4 = por %p5872_p1, %p116_p0  ;;  %p221_p7 = scmp.lt.s32.totalorder %s4788_s27, 3 }
   0xc   : > { %p4874_p6 = por %p188_p3, %p116_p0  ;;  %s4790_s10 = smov [#allocation2]  }
   0xd   : > { %s5885_s30 = scalar_select %p4869_p4, 1, 0 }
   0xe   : > { %s5886_s8 = scalar_select %p4874_p6, 1, 0 }
   0xf   : > { %p4879_p8 = pnand %p2991_p5, %p221_p7  ;;  %s233_s11 = sshll.u32 %s4790_s10, 4  ;;  %s4883_s11 = int_to_ptr.vmem [resolvable:$true] %s233_s11 }
  0x10   : > { %s4895_s13 = sadd.s32 1, %s4788_s27   ;;  %s103_s14 = sadd.s32 1, %s4784_s26 }
  0x11   : > { %s5887_s9 = scalar_select %p4879_p8, 1, 0 }
  0x12   : > { %p4559_p9 = pneg %p4879_p8  ;;  %s100_s15 = ssub.s32 %s4788_s27, %s4895_s13 }
  0x13   : > { %s4628_s18 = scalar_lea.hbm %s5865_s1, 512 }
  0x14   : > { %p4890_p11 = pnand %p4559_p9, %p5872_p1  ;;  %p4629_p12 = scmp.ne.s32.totalorder %s5865_s1, %s4628_s18 }
  0x15   : > { %p4635_p5 = scmp.lt.u32.totalorder %s4628_s18, %s5865_s1 }
  0x16   : > { %p4630_p13 = pneg %p4890_p11 }
  0x18   : > { %p4631_p0 = pnand %p4630_p13, %p4629_p12 }
  0x1a   : > { %p4632_p3 = pneg %p4631_p0 }
  0x1c   : > { %p4637_p7 = pnand %p4635_p5, %p4632_p3 }
  0x1e   : > { %4640 = shalt.err (!%p4637_p7)
}
  0x1f   : > { %s4641_s23 = scalar_lea.vmem %s4883_s11, 512  ;;  %p4649_p2 = scmp.lt.s32.totalorder %s4883_s11, %s4883_s11 }
  0x20   : > { %p4642_p9 = scmp.ne.s32.totalorder %s4883_s11, %s4641_s23  ;;  %p4650_p6 = scmp.lt.s32.totalorder %s4641_s23, %s4641_s23 }
  0x22   : > { %p4644_p10 = pnand %p4642_p9, %p4630_p13  ;;  %p4651_p4 = por %p4650_p6, %p4649_p2 }
  0x24   : > { %p4645_p1 = pneg %p4644_p10 }
  0x26   : > { %p4652_p8 = pnand %p4651_p4, %p4645_p1 }
  0x28   : > { %4655 = shalt.err (!%p4652_p8)
}
  0x29   : > { %s4791_s29 = smov 128   ;;  %s4792_s10 = smov 8  }
  0x2a   : > { %4562 = dma.hbm_to_vmem [thread:$0]  (!%p4890_p11), %s5865_s1, 512, %s4883_s11, [#allocation3], %s4791_s29, %s4791_s29, %s4792_s10  }
  0x2b   : > { %p101_p2 = scmp.eq.s32.totalorder %s100_s15, 0  ;;  %p110_p1 = scmp.ne.s32.totalorder %s4784_s26, %s4780_s25 }
  0x2c   : > { %p111_p4 = scmp.eq.s32.totalorder %s4788_s27, 0  ;;  %p4575_p6 = scmp.lt.s32.totalorder %s4788_s27, 2 }
  0x2d   : > { %s4926_s18 = scalar_select %p101_p2, %s4784_s26, %s103_s14  }
  0x2e   : > { %p112_p8 = por %p111_p4, %p110_p1  ;;  %p5889_p10 = scmp.eq.s32.totalorder %s4860_s28, 1 }
  0x2f   : > { %s263_s20 = sand.u32 1, %s4784_s26   ;;  %s2995_s21 = sshll.u32 %s4788_s27, 7 }
  0x30   : > { %p4930_p12 = por %p5889_p10, %p110_p1  ;;  %s2994_s22 = sshll.u32 %s263_s20, 3 }
  0x31   : > { %s4939_s16 = scalar_lea.hbm %s5867_s3, %s2995_s21  ;;  %s267_s11 = scalar_lea.vmem [#allocation5], %s2994_s22 }
  0x32   : > { %s274_s14 = sshll.u32 %s267_s11, 4  ;;  %p4941_p11 = pnand %p4575_p6, %p112_p8  ;;  %s4945_s14 = int_to_ptr.vmem [resolvable:$true] %s274_s14 }
  0x33   : > { %s264_s29 = scalar_lea.sflag [#allocation6], %s263_s20  ;;  %s4656_s10 = scalar_lea.hbm %s4939_s16, 128 }
  0x34   : > { %p4657_p13 = scmp.ne.s32.totalorder %s4939_s16, %s4656_s10  ;;  %p4658_p0 = pneg %p4941_p11 }
  0x35   : > { %s4661_s22 = scalar_lea.hbm %s5867_s3, 256  ;;  %p4662_p7 = scmp.lt.u32.totalorder %s4939_s16, %s5867_s3 }
  0x36   : > { %p4659_p3 = pnand %p4658_p0, %p4657_p13  ;;  %p4663_p9 = scmp.lt.u32.totalorder %s4661_s22, %s4656_s10 }
  0x37   : > { %p4665_p1 = scmp.lt.u32.totalorder %s4656_s10, %s4939_s16 }
  0x38   : > { %p4660_p5 = pneg %p4659_p3  ;;  %p4664_p2 = por %p4663_p9, %p4662_p7 }
  0x3a   : > { %p4666_p4 = por %p4665_p1, %p4664_p2 }
  0x3c   : > { %p4667_p6 = pnand %p4666_p4, %p4660_p5 }
  0x3e   : > { %4670 = shalt.err (!%p4667_p6)
}
  0x3f   : > { %s4671_s20 = scalar_lea.vmem %s4945_s14, 128  ;;  %s4793_s11 = smov [#allocation5]  }
  0x40   : > { %p4672_p8 = scmp.ne.s32.totalorder %s4945_s14, %s4671_s20  ;;  %s4676_s17 = sshll.u32 %s4793_s11, 4  ;;  %s4677_s17 = int_to_ptr.vmem [resolvable:$false] %s4676_s17 }
  0x41   : > { %s4678_s21 = scalar_lea.vmem %s4677_s17, 256  ;;  %p4679_p3 = scmp.lt.s32.totalorder %s4945_s14, %s4677_s17 }
  0x42   : > { %p4674_p10 = pnand %p4672_p8, %p4658_p0  ;;  %p4680_p7 = scmp.lt.s32.totalorder %s4678_s21, %s4671_s20 }
  0x44   : > { %p4675_p13 = pneg %p4674_p10  ;;  %p4681_p9 = por %p4680_p7, %p4679_p3 }
  0x46   : > { %p4682_p2 = pnand %p4681_p9, %p4675_p13 }
  0x48   : > { %4685 = shalt.err (!%p4682_p2)
}
  0x49   : > { %4566 = dma.hbm_to_vmem [thread:$0]  (!%p4941_p11), %s4939_s16, 128, %s4945_s14, %s264_s29  }
  0x4a   : > { %p5892_p5 = scmp.ne.s32.totalorder %s5887_s9, 0 }
  0x4b   : > { %p5893_p0 = scmp.eq.s32.totalorder (!%p5892_p5), %s4860_s28, 0 }
  0x4c   : > { %283 = sbr.rel (%p5892_p5) target bundleno = 1384 (0x568), region = 44 }
  0x53   : > { %4759 = dma.done.wait (%p5893_p0), [#allocation3], 512   ;;  %p5894_p1 = pmov %p5893_p0 }
  0x54   : > { %s4979_s10 = sand.u32 1, %s4780_s25   ;;  %p5895_p11 = scmp.ne.s32.totalorder %s5885_s30, 0 }
  0x55   : > { %4761 = vsyncadd (%p5894_p1), [#allocation3], 4294966784  ;;  %s4982_s22 = sshll.u32 %s4979_s10, 3  ;;  %s290_s15 = scalar_lea.sflag [#allocation6], %s4979_s10 }
  0x56   : > { %s293_s16 = scalar_lea.vmem [#allocation5], %s4982_s22 }
  0x57   : > { %4763 = dma.done.wait (%p5895_p11), %s290_s15, 128  }
  0x58   : > { %4765 = vsyncadd (%p5895_p11), %s290_s15, 4294967168  ;;  %p333_p4 = scmp.lt.s32.totalorder %s4860_s28, 1  ;;  %v4794_v0 = vmov 0.0|0.0   ;;  %vm4795_vm0 = vmmov 0   ;;  %v4796_v1 = vmov 0.0   ;;  %vm365_vm1 = vcmask 261120  }
  0x59   : > { %4041 = vmatprep.subr.bf16.mxu0 %v4794_v0  ;;  %3353 = vmatprep.mubr.msk.f32.mxu0 %vm4795_vm0, %v4796_v1  ;;  %v338_v2 = vld [vmem:[#allocation2] sm:$0xff]  ;;  %v339_v3 = vld [vmem:[#allocation2 + $0x8] sm:$0xff]  ;;  %v340_v4 = vld [vmem:[#allocation2 + $0x10] sm:$0xff]  ;;  %s2838_s11 = scalar_lea.sflag [#allocation9], %s4979_s10  ;;  %s4797_s21 = smov [#allocation8]  }
  0x5a   : > { %s334_s9 = scalar_select %p333_p4, %s4860_s28, 1  ;;  %4125 = vmatprep.subr.bf16.mxu1 %v4794_v0  ;;  %3513 = vmatprep.mubr.msk.f32.mxu1 %vm4795_vm0, %v4796_v1  ;;  %v370_v5 = vand.u32 4294901760, %v338_v2  ;;  %v373_v6 = vand.u32 4294901760, %v339_v3  ;;  %v341_v7 = vld [vmem:[#allocation2 + $0x18] sm:$0xff]  ;;  %v376_v8 = vand.u32 4294901760, %v340_v4  ;;  %v342_v41 = vld [vmem:[%s5868_s4] sm:$0xff] }
  0x5b   : > { %v379_v10 = vand.u32 4294901760, %v341_v7  ;;  %v343_v42 = vld [vmem:[%s5868_s4 + $0x8] sm:$0xff]  ;;  %v344_v43 = vld [vmem:[%s5868_s4 + $0x10] sm:$0xff]  ;;  %v860_v44 = vand.u32 4294901760, %v342_v41  ;;  %v345_v46 = vld [vmem:[%s5868_s4 + $0x18] sm:$0xff]  ;;  %s4690_s15 = sshll.u32 %s4797_s21, 4  ;;  %s4691_s15 = int_to_ptr.vmem [resolvable:$false] %s4690_s15 }
  0x5c   : > { %s3001_s14 = sshll.u32 %s334_s9, 3  ;;  %v4042_v12 = vpack.c.bf16 %v373_v6, %v370_v5  ;;  %v450_v13 = vsub.f32 %v338_v2, %v370_v5  ;;  %v457_v14 = vsub.f32 %v339_v3, %v373_v6  ;;  %v464_v15 = vsub.f32 %v340_v4, %v376_v8  ;;  %v346_v48 = vld [vmem:[%s5868_s4 + $0x20] sm:$0xff]  ;;  %v347_v49 = vld [vmem:[%s5868_s4 + $0x28] sm:$0xff]  ;;  %v348_v58 = vld [vmem:[%s5868_s4 + $0x30] sm:$0xff]  ;;  %s4692_s9 = scalar_lea.vmem %s4691_s15, 256 }
  0x5d   : > { %s336_s12 = scalar_lea.vmem %s5864_s0, %s3001_s14  ;;  %v471_v16 = vsub.f32 %v341_v7, %v379_v10  ;;  %v4045_v18 = vpack.c.bf16 %v379_v10, %v376_v8  ;;  %v863_v45 = vand.u32 4294901760, %v343_v42  ;;  %v866_v47 = vand.u32 4294901760, %v344_v43  ;;  %v349_v59 = vld [vmem:[%s5868_s4 + $0x38] sm:$0xff]  ;;  %s3005_s14 = sshll.u32 %s4860_s28, 7 }
  0x5e   : > { %v337_v9 = vld [vmem:[%s336_s12] sm:$0xff]  ;;  %4043 = vmatpush3.bf16.msra.mxu0 %v4042_v12  ;;  %v451_v19 = vand.u32 4294901760, %v450_v13  ;;  %v458_v20 = vand.u32 4294901760, %v457_v14  ;;  %v465_v21 = vand.u32 4294901760, %v464_v15  ;;  %v4054_v37 = vpack.c.bf16 %v457_v14, %v450_v13  ;;  %s332_s12 = scalar_lea.vmem [#allocation8], %s4982_s22  ;;  %s5792_s23 = scalar_lea.hbm %s5871_s7, %s3005_s14 }
  0x5f   : > { %v367_v11 = vsel %vm365_vm1, %v337_v9, 0  ;;  %4044 = vmatprep.subr.bf16.mxu0 %v4794_v0  ;;  %v472_v23 = vand.u32 4294901760, %v471_v16  ;;  %v4057_v38 = vpack.c.bf16 %v471_v16, %v464_v15  ;;  %v869_v50 = vand.u32 4294901760, %v345_v46  ;;  %s2864_s20 = sshll.u32 %s332_s12, 4  ;;  %s2865_s20 = int_to_ptr.vmem [resolvable:$true] %s2864_s20 }
  0x60   : > { %v438_v17 = vand.u32 4294901760, %v367_v11  ;;  %v452_v24 = vsub.f32 %v450_v13, %v451_v19  ;;  %v459_v25 = vsub.f32 %v457_v14, %v458_v20  ;;  %v466_v26 = vsub.f32 %v464_v15, %v465_v21  ;;  %s4686_s17 = scalar_lea.vmem %s2865_s20, 128  ;;  %p4693_p13 = scmp.lt.s32.totalorder %s2865_s20, %s4691_s15 }
  0x61   : > { %v473_v28 = vsub.f32 %v471_v16, %v472_v23  ;;  %v4066_v39 = vpack.c.bf16 %v458_v20, %v451_v19  ;;  %v4069_v40 = vpack.c.bf16 %v472_v23, %v465_v21  ;;  %v872_v51 = vand.u32 4294901760, %v346_v48  ;;  %v3002_v19 = vld [vmem:[%s5866_s2] ss:$0 sm:$0xff]  ;;  %p4687_p6 = scmp.ne.s32.totalorder %s2865_s20, %s4686_s17  ;;  %p4694_p3 = scmp.lt.s32.totalorder %s4692_s9, %s4686_s17 }
  0x62   : > { %v439_v22 = vsub.f32 %v367_v11, %v438_v17  ;;  %4046 = vmatpush3.bf16.msra.mxu0 %v4045_v18  ;;  %v453_v29 = vand.u32 4294901760, %v452_v24  ;;  %v460_v30 = vand.u32 4294901760, %v459_v25  ;;  %v467_v33 = vand.u32 4294901760, %v466_v26  ;;  %v1509_v11 = vld [vmem:[%s293_s16] sm:$0xff] }
  0x63   : > { %4047 = vmatprep.subr.bf16.mxu0 %v4794_v0  ;;  %v474_v34 = vand.u32 4294901760, %v473_v28  ;;  %v875_v52 = vand.u32 4294901760, %v347_v49  ;;  %v5043_v53 = vpack.c.bf16 %v863_v45, %v860_v44  ;;  %v5045_v54 = vsub.f32 %v342_v41, %v860_v44  ;;  %v350_v25 = vld [vmem:[%s5868_s4 + $0x40] sm:$0xff]  ;;  %v351_v26 = vld [vmem:[%s5868_s4 + $0x48] sm:$0xff]  ;;  %p4688_p8 = pnand %p4687_p6, %p4930_p12  ;;  %p4695_p7 = por %p4694_p3, %p4693_p13 }
  0x64   : > { %v440_v27 = vand.u32 4294901760, %v439_v22  ;;  %v4048_v32 = vpack.c.bf16 %v460_v30, %v453_v29  ;;  %v5047_v55 = vsub.f32 %v343_v42, %v863_v45  ;;  %v5049_v56 = vsub.f32 %v344_v43, %v866_v47 }
  0x65   : > { %v4051_v36 = vpack.c.bf16 %v474_v34, %v467_v33  ;;  %v5051_v57 = vsub.f32 %v345_v46, %v869_v50  ;;  %v5063_v61 = vpack.c.bf16 %v869_v50, %v866_v47  ;;  %v5066_v62 = vsub.f32 %v346_v48, %v872_v51  ;;  %v356_v47 = vld [vmem:[%s5868_s4 + $0x70] sm:$0xff]  ;;  %v357_v48 = vld [vmem:[%s5868_s4 + $0x78] sm:$0xff]  ;;  %p4689_p10 = pneg %p4688_p8 }
  0x66   : > { %v441_v31 = vsub.f32 %v439_v22, %v440_v27  ;;  %v5061_v60 = vpack.c.bf16 %v5047_v55, %v5045_v54  ;;  %v5074_v2 = vsub.f32 %v347_v49, %v875_v52  ;;  %v878_v3 = vand.u32 4294901760, %v348_v58 }
  0x67   : > { %v5072_v63 = vpack.c.bf16 %v5051_v57, %v5049_v56  ;;  %v881_v4 = vand.u32 4294901760, %v349_v59  ;;  %v5077_v5 = vpack.c.bf16 %v875_v52, %v872_v51  ;;  %v887_v28 = vand.u32 4294901760, %v351_v26  ;;  %p4696_p9 = pnand %p4695_p7, %p4689_p10 }
  0x68   : > { %v442_v35 = vand.u32 4294901760, %v441_v31  ;;  %4127 = vmatpush3.bf16.msra.mxu1 %v5061_v60  ;;  %v5084_v6 = vpack.c.bf16 %v5074_v2, %v5066_v62  ;;  %v5086_v7 = vsub.f32 %v348_v58, %v878_v3  ;;  %v352_v31 = vld [vmem:[%s5868_s4 + $0x50] sm:$0xff]  ;;  %v902_v50 = vand.u32 4294901760, %v356_v47 }
  0x69   : > { %4128 = vmatprep.subr.bf16.mxu1 %v4794_v0  ;;  %v5088_v8 = vsub.f32 %v349_v59, %v881_v4  ;;  %v5091_v9 = vpack.c.bf16 %v881_v4, %v878_v3  ;;  %v5125_v30 = vsub.f32 %v351_v26, %v887_v28  ;;  %v890_v34 = vand.u32 4294901760, %v352_v31 }
  0x6a   : > { %3354 = vmatmul.mubr.f32.vlgmr.msra.gmra.mrb[0].mxu0 %v442_v35  ;;  %v905_v51 = vand.u32 4294901760, %v357_v48  ;;  %v1050_v58 = vsub.f32 %v356_v47, %v902_v50 }
  0x6b   : > { %4049 = vmatpush3.bf16.msra.mxu0 %v4048_v32  ;;  %3364 = vmatprep.mubr.msk.f32.mxu0 %vm4795_vm0, %v4796_v1  ;;  %v5098_v10 = vpack.c.bf16 %v5088_v8, %v5086_v7  ;;  %v353_v32 = vld [vmem:[%s5868_s4 + $0x58] sm:$0xff] }
  0x6c   : > { %4050 = vmatprep.subr.bf16.mxu0 %v4794_v0  ;;  %4130 = vmatpush3.bf16.msra.mxu1 %v5072_v63  ;;  %v893_v35 = vand.u32 4294901760, %v353_v32  ;;  %v1057_v59 = vsub.f32 %v357_v48, %v905_v51  ;;  %v5177_v4 = vpack.c.bf16 %v905_v51, %v902_v50 }
  0x6d   : > { %4131 = vmatprep.subr.bf16.mxu1 %v4794_v0 }
  0x6e   : > { %v5158_v46 = vpack.c.bf16 %v893_v35, %v890_v34  ;;  %v5175_v3 = vpack.c.bf16 %v1057_v59, %v1050_v58 }
  0x6f   : > { %4052 = vmatpush3.bf16.msra.mxu0 %v4051_v36  ;;  %v5138_v36 = vsub.f32 %v352_v31, %v890_v34  ;;  %v1051_v34 = vand.u32 4294901760, %v1050_v58 }
  0x70   : > { %4053 = vmatprep.subr.bf16.mxu0 %v4794_v0  ;;  %4133 = vmatpush3.bf16.msra.mxu1 %v5084_v6 }
  0x71   : > { %4134 = vmatprep.subr.bf16.mxu1 %v4794_v0 }
  0x72   : > { %3365 = vmatmul.mubr.f32.vlgmr.msra.gmra.mrb[0].mxu0 %v438_v17 }
  0x73   : > { %4055 = vmatpush3.bf16.msra.mxu0 %v4054_v37  ;;  %3375 = vmatprep.mubr.msk.f32.mxu0 %vm4795_vm0, %v4796_v1  ;;  %v5140_v37 = vsub.f32 %v353_v32, %v893_v35  ;;  %v1058_v35 = vand.u32 4294901760, %v1057_v59 }
  0x74   : > { %4056 = vmatprep.subr.bf16.mxu0 %v4794_v0  ;;  %4136 = vmatpush3.bf16.msra.mxu1 %v5098_v10 }
  0x75   : > { %4137 = vmatprep.subr.bf16.mxu1 %v4794_v0  ;;  %v5153_v41 = vpack.c.bf16 %v5140_v37, %v5138_v36 }
  0x77   : > { %4058 = vmatpush3.bf16.msra.mxu0 %v4057_v38 }
  0x78   : > { %4059 = vmatprep.subr.bf16.mxu0 %v4794_v0 }
  0x7a   : > { %3376 = vmatmul.mubr.f32.vlgmr.msra.gmra.mrb[0].mxu0 %v439_v22 }
  0x7b   : > { %4061 = vmatpush3.bf16.msra.mxu0 %v4042_v12  ;;  %3386 = vmatprep.mubr.msk.f32.mxu0 %vm4795_vm0, %v4796_v1 }
  0x7c   : > { %4062 = vmatprep.subr.bf16.mxu0 %v4794_v0 }
  0x7f   : > { %4064 = vmatpush3.bf16.msra.mxu0 %v4045_v18 }
  0x80   : > { %4065 = vmatprep.subr.bf16.mxu0 %v4794_v0 }
  0x82   : > { %3387 = vmatmul.mubr.f32.vlgmr.msra.gmra.mrb[0].mxu0 %v440_v27  ;;  %v884_v27 = vand.u32 4294901760, %v350_v25 }
  0x83   : > { %4067 = vmatpush3.bf16.msra.mxu0 %v4066_v39  ;;  %3397 = vmatprep.mubr.msk.f32.mxu0 %vm4795_vm0, %v4796_v1  ;;  %v354_v39 = vld [vmem:[%s5868_s4 + $0x60] sm:$0xff] }
  0x84   : > { %4068 = vmatprep.subr.bf16.mxu0 %v4794_v0  ;;  %v5123_v29 = vsub.f32 %v350_v25, %v884_v27  ;;  %v5142_v38 = vpack.c.bf16 %v887_v28, %v884_v27  ;;  %v896_v42 = vand.u32 4294901760, %v354_v39 }
  0x86   : > { %v5135_v33 = vpack.c.bf16 %v5125_v30, %v5123_v29  ;;  %v1036_v44 = vsub.f32 %v354_v39, %v896_v42 }
  0x87   : > { %4070 = vmatpush3.bf16.msra.mxu0 %v4069_v40  ;;  %v355_v40 = vld [vmem:[%s5868_s4 + $0x68] sm:$0xff] }
  0x88   : > { %4071 = vmatprep.subr.bf16.mxu0 %v4794_v0  ;;  %4139 = vmatpush3.bf16.msra.mxu1 %v5135_v33  ;;  %v899_v43 = vand.u32 4294901760, %v355_v40  ;;  %v1037_v26 = vand.u32 4294901760, %v1036_v44 }
  0x89   : > { %4140 = vmatprep.subr.bf16.mxu1 %v4794_v0 }
  0x8a   : > { %3398 = vmatmul.mubr.f32.vlgmr.msra.gmra.mrb[0].mxu0 %v438_v17  ;;  %v1043_v45 = vsub.f32 %v355_v40, %v899_v43  ;;  %v5169_v52 = vpack.c.bf16 %v899_v43, %v896_v42  ;;  %v1052_v40 = vsub.f32 %v1050_v58, %v1051_v34  ;;  %v1059_v42 = vsub.f32 %v1057_v59, %v1058_v35 }
  0x8b   : > { %4073 = vmatpush3.bf16.msra.mxu0 %v4042_v12  ;;  %3408 = vmatprep.mubr.msk.f32.mxu0 %vm4795_vm0, %v4796_v1  ;;  %v1510_v12 = vadd.f32 1e-08, %v1509_v11  ;;  %v1009_v11 = vand.u32 4294901760, %v5123_v29  ;;  %v953_v58 = vand.u32 4294901760, %v5045_v54  ;;  %v960_v59 = vand.u32 4294901760, %v5047_v55 }
  0x8c   : > { %4074 = vmatprep.subr.bf16.mxu0 %v4794_v0  ;;  %4142 = vmatpush3.bf16.msra.mxu1 %v5153_v41  ;;  %v5167_v49 = vpack.c.bf16 %v1043_v45, %v1036_v44  ;;  %v1044_v27 = vand.u32 4294901760, %v1043_v45  ;;  %v1053_v43 = vand.u32 4294901760, %v1052_v40  ;;  %v995_v40 = vand.u32 4294901760, %v5086_v7 }
  0x8d   : > { %4616 = vlog2.f32 %v1510_v12  ;;  %4143 = vmatprep.subr.bf16.mxu1 %v4794_v0  ;;  %v1016_v12 = vand.u32 4294901760, %v5125_v30 }
  0x8e   : > { %v5205_v50 = vpack.c.bf16 %v1044_v27, %v1037_v26 }
  0x8f   : > { %4076 = vmatpush3.bf16.msra.mxu0 %v4045_v18 }
  0x90   : > { %4077 = vmatprep.subr.bf16.mxu0 %v4794_v0  ;;  %4145 = vmatpush3.bf16.msra.mxu1 %v5167_v49 }
  0x91   : > { %4146 = vmatprep.subr.bf16.mxu1 %v4794_v0 }
  0x92   : > { %3409 = vmatmul.mubr.f32.vlgmr.msra.gmra.mrb[0].mxu0 %v438_v17 }
  0x93   : > { %3443 = vmatprep.mubr.msk.f32.mxu0 %vm4795_vm0, %v4796_v1  ;;  %4079 = vmatpush3.bf16.msra.mxu0 %v5043_v53 }
  0x94   : > { %4080 = vmatprep.subr.bf16.mxu0 %v4794_v0  ;;  %4148 = vmatpush3.bf16.msra.mxu1 %v5175_v3 }
  0x95   : > { %4149 = vmatprep.subr.bf16.mxu1 %v4794_v0 }
  0x97   : > { %4082 = vmatpush3.bf16.msra.mxu0 %v5063_v61  ;;  %v4617_v13 = vpop.eup %4616 }
  0x98   : > { %4083 = vmatprep.subr.bf16.mxu0 %v4794_v0  ;;  %v1512_v14 = vmul.f32 0.6931472, %v4617_v13  ;;  %v1010_v13 = vsub.f32 %v5123_v29, %v1009_v11  ;;  %v1038_v29 = vsub.f32 %v1036_v44, %v1037_v26  ;;  %v5207_v44 = vpack.c.bf16 %v1058_v35, %v1051_v34 }
  0x99   : > { %v988_v26 = vand.u32 4294901760, %v5074_v2 }
  0x9a   : > { %v1513_v15 = vsub.f32 0.0, %v1512_v14  ;;  %v1017_v14 = vsub.f32 %v5125_v30, %v1016_v12  ;;  %v1045_v30 = vsub.f32 %v1043_v45, %v1044_v27  ;;  %v1039_v31 = vand.u32 4294901760, %v1038_v29 }
  0x9b   : > { %4085 = vmatpush3.bf16.msra.mxu0 %v5077_v5  ;;  %v989_v35 = vsub.f32 %v5074_v2, %v988_v26 }
  0x9c   : > { %4086 = vmatprep.subr.bf16.mxu0 %v4794_v0  ;;  %v1514_v16 = vadd.f32 1e-08, %v1513_v15  ;;  %v1011_v15 = vand.u32 4294901760, %v1010_v13  ;;  %v1046_v32 = vand.u32 4294901760, %v1045_v30 }
  0x9e   : > { %4618 = vlog2.f32 %v1514_v16  ;;  %v1018_v16 = vand.u32 4294901760, %v1017_v14  ;;  %v5197_v39 = vpack.c.bf16 %v1046_v32, %v1039_v31  ;;  %v967_v14 = vand.u32 4294901760, %v5049_v56 }
  0x9f   : > { %4088 = vmatpush3.bf16.msra.mxu0 %v5091_v9 }
  0xa0   : > { %4089 = vmatprep.subr.bf16.mxu0 %v4794_v0 }
  0xa3   : > { %4091 = vmatpush3.bf16.msra.mxu0 %v5142_v38 }
  0xa4   : > { %4092 = vmatprep.subr.bf16.mxu0 %v4794_v0 }
  0xa7   : > { %4094 = vmatpush3.bf16.msra.mxu0 %v5158_v46 }
  0xa8   : > { %v4619_v17 = vpop.eup %4618  ;;  %4095 = vmatprep.subr.bf16.mxu0 %v4794_v0 }
  0xa9   : > { %v1516_v18 = vmul.f32 0.6931472, %v4619_v17  ;;  %v1023_v17 = vand.u32 4294901760, %v5138_v36 }
  0xab   : > { %v1517_v23 = vsub.f32 0.0, %v1516_v18  ;;  %4097 = vmatpush3.bf16.msra.mxu0 %v5169_v52  ;;  %v1030_v18 = vand.u32 4294901760, %v5140_v37 }
  0xac   : > { %4098 = vmatprep.subr.bf16.mxu0 %v4794_v0 }
  0xad   : > { %v5203_v48 = vpack.c.bf16 %v1030_v18, %v1023_v17 }
  0xaf   : > { %4100 = vmatpush3.bf16.msra.mxu0 %v5177_v4 }
  0xb0   : > { %4101 = vmatprep.subr.bf16.mxu0 %v4794_v0 }
 0x165   : > { %v850_v20 = vpop.f32.mrb[0].mxu0 }
 0x166   : > { %v5110_v21 = vadd.f32 %v3002_v19, %v850_v20  ;;  %v3410_v22 = vpop.f32.mrb[1].mxu0  ;;  %v5191_v19 = vpack.c.bf16 %v1018_v16, %v1011_v15  ;;  %v1024_v20 = vsub.f32 %v5138_v36, %v1023_v17  ;;  %v1060_v36 = vand.u32 4294901760, %v1059_v42 }
 0x167   : > { %v1031_v22 = vsub.f32 %v5140_v37, %v1030_v18  ;;  %v5201_v37 = vpack.c.bf16 %v1016_v12, %v1009_v11  ;;  %v954_v11 = vsub.f32 %v5045_v54, %v953_v58  ;;  %v961_v12 = vsub.f32 %v5047_v55, %v960_v59 }
 0x168   : > { %854 = vmax.xlane.f32.xlu0 %v5110_v21  ;;  %v5114_v24 = vadd.f32 %v5110_v21, %v1517_v23  ;;  %v1025_v23 = vand.u32 4294901760, %v1024_v20  ;;  %v5199_v47 = vpack.c.bf16 %v1060_v36, %v1053_v43  ;;  %v974_v15 = vand.u32 4294901760, %v5051_v57 }
 0x169   : > { %v1032_v25 = vand.u32 4294901760, %v1031_v22  ;;  %v955_v17 = vand.u32 4294901760, %v954_v11  ;;  %v962_v20 = vand.u32 4294901760, %v961_v12  ;;  %v968_v22 = vsub.f32 %v5049_v56, %v967_v14 }
 0x16a   : > { %v1002_v42 = vand.u32 4294901760, %v5088_v8  ;;  %v5299_v54 = vpack.c.bf16 %v974_v15, %v967_v14 }
 0x16b   : > { %v5195_v28 = vpack.c.bf16 %v1032_v25, %v1025_v23  ;;  %v975_v23 = vsub.f32 %v5051_v57, %v974_v15  ;;  %v981_v25 = vand.u32 4294901760, %v5066_v62  ;;  %v5239_v30 = vpack.c.bf16 %v962_v20, %v955_v17  ;;  %v2180_v15 = vld [vmem:[%s5869_s5 + $0x38] sm:$0xff] }
 0x16c   : > { %1519 = vmax.xlane.f32.xlu0 %v5114_v24  ;;  %v969_v31 = vand.u32 4294901760, %v968_v22  ;;  %v1003_v11 = vsub.f32 %v5088_v8, %v1002_v42  ;;  %v5288_v20 = vpack.c.bf16 %v960_v59, %v953_v58  ;;  %v5320_v57 = vpack.c.bf16 %v1002_v42, %v995_v40  ;;  %v2183_v42 = vld [vmem:[%s5869_s5 + $0x50] sm:$0xff] }
 0x16d   : > { %v976_v32 = vand.u32 4294901760, %v975_v23  ;;  %v982_v34 = vsub.f32 %v5066_v62, %v981_v25  ;;  %v5311_v56 = vpack.c.bf16 %v988_v26, %v981_v25  ;;  %v2211_v25 = vand.u32 4294901760, %v2180_v15 }
 0x16f   : > { %v5251_v36 = vpack.c.bf16 %v976_v32, %v969_v31 }
 0x1f5   : > { %v855_v45 = vpop.xlane.xlu0 %854 }
 0x1f6   : > { %v856_v51 = vsub.f32 %v5110_v21, %v855_v45  ;;  %v983_v45 = vand.u32 4294901760, %v982_v34 }
 0x1f8   : > { %v857_v13 = vmul.f32 1.442695, %v856_v51  ;;  %v990_v51 = vand.u32 4294901760, %v989_v35 }
 0x1f9   : > { %v1520_v8 = vpop.xlane.xlu0 %1519 }
 0x1fa   : > { %4620 = vpow2.f32 %v857_v13  ;;  %v996_v13 = vsub.f32 %v5086_v7, %v995_v40  ;;  %v5262_v12 = vpack.c.bf16 %v990_v51, %v983_v45  ;;  %v1521_v22 = vsub.f32 %v5114_v24, %v1520_v8 }
 0x1fb   : > { %v2220_v45 = vand.u32 4294901760, %v2183_v42 }
 0x1fc   : > { %v997_v17 = vand.u32 4294901760, %v996_v13  ;;  %v1522_v55 = vmul.f32 1.442695, %v1521_v22 }
 0x1fe   : > { %4622 = vpow2.f32 %v1522_v55 }
 0x204   : > { %v5220_v16 = vpop.eup %4620 }
 0x205   : > { %v5223_v21 = vand.u32 4294901760, %v5220_v16 }
 0x207   : > { %v941_v18 = vsub.f32 %v5220_v16, %v5223_v21 }
 0x208   : > { %v5329_v62 = vpop.eup %4622 }
 0x209   : > { %v942_v27 = vand.u32 4294901760, %v941_v18  ;;  %3514 = vmatmul.mubr.f32.vlgmr.msra.gmra.mrb[0].mxu1 %v941_v18  ;;  %v5336_v2 = vand.u32 4294901760, %v5329_v62 }
 0x20a   : > { %4151 = vmatpush3.bf16.msra.mxu1 %v5043_v53  ;;  %3548 = vmatprep.mubr.msk.f32.mxu1 %vm4795_vm0, %v4796_v1 }
 0x20b   : > { %4152 = vmatprep.subr.bf16.mxu1 %v4794_v0  ;;  %v943_v29 = vsub.f32 %v941_v18, %v942_v27  ;;  %v1004_v18 = vand.u32 4294901760, %v1003_v11  ;;  %v5344_v24 = vsub.f32 %v5329_v62, %v5336_v2  ;;  %v2185_v11 = vld [vmem:[%s5869_s5 + $0x60] sm:$0xff] }
 0x20d   : > { %v944_v43 = vand.u32 4294901760, %v943_v29  ;;  %v5268_v7 = vpack.c.bf16 %v1004_v18, %v997_v17  ;;  %v1607_v58 = vand.u32 4294901760, %v5344_v24  ;;  %v2181_v29 = vld [vmem:[%s5869_s5 + $0x40] sm:$0xff] }
 0x20e   : > { %4154 = vmatpush3.bf16.msra.mxu1 %v5063_v61  ;;  %v2214_v32 = vand.u32 4294901760, %v2181_v29 }
 0x20f   : > { %3444 = vmatmul.mubr.f32.vlgmr.msra.gmra.mrb[2].mxu0 %v944_v43  ;;  %4155 = vmatprep.subr.bf16.mxu1 %v4794_v0  ;;  %v1608_v59 = vsub.f32 %v5344_v24, %v1607_v58  ;;  %v2184_v43 = vld [vmem:[%s5869_s5 + $0x58] sm:$0xff] }
 0x210   : > { %4103 = vmatpush3.bf16.msra.mxu0 %v5239_v30  ;;  %3478 = vmatprep.mubr.msk.f32.mxu0 %vm4795_vm0, %v4796_v1  ;;  %v2223_v51 = vand.u32 4294901760, %v2184_v43 }
 0x211   : > { %4104 = vmatprep.subr.bf16.mxu0 %v4794_v0  ;;  %v1609_v14 = vand.u32 4294901760, %v1608_v59 }
 0x212   : > { %4157 = vmatpush3.bf16.msra.mxu1 %v5077_v5  ;;  %v5534_v13 = vpack.c.bf16 %v2223_v51, %v2220_v45 }
 0x213   : > { %4158 = vmatprep.subr.bf16.mxu1 %v4794_v0 }
 0x214   : > { %4106 = vmatpush3.bf16.msra.mxu0 %v5251_v36 }
 0x215   : > { %4107 = vmatprep.subr.bf16.mxu0 %v4794_v0 }
 0x216   : > { %4160 = vmatpush3.bf16.msra.mxu1 %v5091_v9 }
 0x217   : > { %4161 = vmatprep.subr.bf16.mxu1 %v4794_v0 }
 0x218   : > { %4109 = vmatpush3.bf16.msra.mxu0 %v5262_v12 }
 0x219   : > { %4110 = vmatprep.subr.bf16.mxu0 %v4794_v0 }
 0x21a   : > { %4163 = vmatpush3.bf16.msra.mxu1 %v5142_v38 }
 0x21b   : > { %4164 = vmatprep.subr.bf16.mxu1 %v4794_v0 }
 0x21c   : > { %4112 = vmatpush3.bf16.msra.mxu0 %v5268_v7 }
 0x21d   : > { %4113 = vmatprep.subr.bf16.mxu0 %v4794_v0 }
 0x21e   : > { %4166 = vmatpush3.bf16.msra.mxu1 %v5158_v46 }
 0x21f   : > { %4167 = vmatprep.subr.bf16.mxu1 %v4794_v0 }
 0x220   : > { %4115 = vmatpush3.bf16.msra.mxu0 %v5191_v19 }
 0x221   : > { %4116 = vmatprep.subr.bf16.mxu0 %v4794_v0 }
 0x222   : > { %4169 = vmatpush3.bf16.msra.mxu1 %v5169_v52 }
 0x223   : > { %4170 = vmatprep.subr.bf16.mxu1 %v4794_v0 }
 0x224   : > { %4118 = vmatpush3.bf16.msra.mxu0 %v5195_v28 }
 0x225   : > { %4119 = vmatprep.subr.bf16.mxu0 %v4794_v0 }
 0x226   : > { %4172 = vmatpush3.bf16.msra.mxu1 %v5177_v4 }
 0x227   : > { %4173 = vmatprep.subr.bf16.mxu1 %v4794_v0 }
 0x228   : > { %4121 = vmatpush3.bf16.msra.mxu0 %v5197_v39 }
 0x229   : > { %3549 = vmatmul.mubr.f32.vlgmr.msra.gmra.mrb[0].mxu1 %v942_v27  ;;  %4122 = vmatprep.subr.bf16.mxu0 %v4794_v0 }
 0x22a   : > { %4175 = vmatpush3.bf16.msra.mxu1 %v5288_v20  ;;  %3583 = vmatprep.mubr.msk.f32.mxu1 %vm4795_vm0, %v4796_v1 }
 0x22b   : > { %4176 = vmatprep.subr.bf16.mxu1 %v4794_v0 }
 0x22c   : > { %4124 = vmatpush3.bf16.msra.mxu0 %v5199_v47 }
 0x22d   : > { %4221 = vmatprep.subr.bf16.mxu0 %v4794_v0 }
 0x22e   : > { %4178 = vmatpush3.bf16.msra.mxu1 %v5299_v54 }
 0x22f   : > { %3479 = vmatmul.mubr.f32.vlgmr.msra.gmra.mrb[2].mxu0 %v5223_v21  ;;  %4179 = vmatprep.subr.bf16.mxu1 %v4794_v0 }
 0x230   : > { %4223 = vmatpush3.bf16.msra.mxu0 %v5043_v53  ;;  %3653 = vmatprep.mubr.msk.f32.mxu0 %vm4795_vm0, %v4796_v1 }
 0x231   : > { %4224 = vmatprep.subr.bf16.mxu0 %v4794_v0 }
 0x232   : > { %4181 = vmatpush3.bf16.msra.mxu1 %v5311_v56 }
 0x233   : > { %4182 = vmatprep.subr.bf16.mxu1 %v4794_v0 }
 0x234   : > { %4226 = vmatpush3.bf16.msra.mxu0 %v5063_v61 }
 0x235   : > { %4227 = vmatprep.subr.bf16.mxu0 %v4794_v0 }
 0x236   : > { %4184 = vmatpush3.bf16.msra.mxu1 %v5320_v57 }
 0x237   : > { %4185 = vmatprep.subr.bf16.mxu1 %v4794_v0 }
 0x238   : > { %4229 = vmatpush3.bf16.msra.mxu0 %v5077_v5 }
 0x239   : > { %4230 = vmatprep.subr.bf16.mxu0 %v4794_v0 }
 0x23a   : > { %4187 = vmatpush3.bf16.msra.mxu1 %v5201_v37 }
 0x23b   : > { %4188 = vmatprep.subr.bf16.mxu1 %v4794_v0 }
 0x23c   : > { %4232 = vmatpush3.bf16.msra.mxu0 %v5091_v9 }
 0x23d   : > { %4233 = vmatprep.subr.bf16.mxu0 %v4794_v0 }
 0x23e   : > { %4190 = vmatpush3.bf16.msra.mxu1 %v5203_v48 }
 0x23f   : > { %4191 = vmatprep.subr.bf16.mxu1 %v4794_v0 }
 0x240   : > { %4235 = vmatpush3.bf16.msra.mxu0 %v5142_v38 }
 0x241   : > { %4236 = vmatprep.subr.bf16.mxu0 %v4794_v0 }
 0x242   : > { %4193 = vmatpush3.bf16.msra.mxu1 %v5205_v50 }
 0x243   : > { %4194 = vmatprep.subr.bf16.mxu1 %v4794_v0 }
 0x244   : > { %4238 = vmatpush3.bf16.msra.mxu0 %v5158_v46 }
 0x245   : > { %4239 = vmatprep.subr.bf16.mxu0 %v4794_v0 }
 0x246   : > { %4196 = vmatpush3.bf16.msra.mxu1 %v5207_v44 }
 0x247   : > { %4197 = vmatprep.subr.bf16.mxu1 %v4794_v0 }
 0x248   : > { %4241 = vmatpush3.bf16.msra.mxu0 %v5169_v52 }
 0x249   : > { %3584 = vmatmul.mubr.f32.vlgmr.msra.gmra.mrb[0].mxu1 %v5223_v21  ;;  %4242 = vmatprep.subr.bf16.mxu0 %v4794_v0 }
 0x24a   : > { %4199 = vmatpush3.bf16.msra.mxu1 %v5043_v53  ;;  %3618 = vmatprep.mubr.msk.f32.mxu1 %vm4795_vm0, %v4796_v1 }
 0x24b   : > { %4200 = vmatprep.subr.bf16.mxu1 %v4794_v0 }
 0x24c   : > { %4244 = vmatpush3.bf16.msra.mxu0 %v5177_v4 }
 0x24d   : > { %4245 = vmatprep.subr.bf16.mxu0 %v4794_v0 }
 0x24e   : > { %4202 = vmatpush3.bf16.msra.mxu1 %v5063_v61 }
 0x24f   : > { %3654 = vmatmul.mubr.f32.vlgmr.msra.gmra.mrb[4].mxu0 %v1609_v14  ;;  %4203 = vmatprep.subr.bf16.mxu1 %v4794_v0  ;;  %v5577_v14 = vsub.f32 %v2183_v42, %v2220_v45 }
 0x250   : > { %4247 = vmatpush3.bf16.msra.mxu0 %v5239_v30  ;;  %3688 = vmatprep.mubr.msk.f32.mxu0 %vm4795_vm0, %v4796_v1  ;;  %v2182_v30 = vld [vmem:[%s5869_s5 + $0x48] sm:$0xff] }
 0x251   : > { %4248 = vmatprep.subr.bf16.mxu0 %v4794_v0  ;;  %v2217_v34 = vand.u32 4294901760, %v2182_v30 }
 0x252   : > { %4205 = vmatpush3.bf16.msra.mxu1 %v5077_v5 }
 0x253   : > { %4206 = vmatprep.subr.bf16.mxu1 %v4794_v0  ;;  %v5523_v40 = vpack.c.bf16 %v2217_v34, %v2214_v32  ;;  %v5574_v59 = vsub.f32 %v2182_v30, %v2217_v34 }
 0x254   : > { %4250 = vmatpush3.bf16.msra.mxu0 %v5251_v36 }
 0x255   : > { %4251 = vmatprep.subr.bf16.mxu0 %v4794_v0 }
 0x256   : > { %4208 = vmatpush3.bf16.msra.mxu1 %v5091_v9 }
 0x257   : > { %4209 = vmatprep.subr.bf16.mxu1 %v4794_v0 }
 0x258   : > { %4253 = vmatpush3.bf16.msra.mxu0 %v5262_v12  ;;  %v2186_v12 = vld [vmem:[%s5869_s5 + $0x68] sm:$0xff] }
 0x259   : > { %4254 = vmatprep.subr.bf16.mxu0 %v4794_v0  ;;  %v2229_v17 = vand.u32 4294901760, %v2186_v12 }
 0x25a   : > { %4211 = vmatpush3.bf16.msra.mxu1 %v5142_v38 }
 0x25b   : > { %4212 = vmatprep.subr.bf16.mxu1 %v4794_v0 }
 0x25c   : > { %4256 = vmatpush3.bf16.msra.mxu0 %v5268_v7 }
 0x25d   : > { %4257 = vmatprep.subr.bf16.mxu0 %v4794_v0 }
 0x25e   : > { %4214 = vmatpush3.bf16.msra.mxu1 %v5158_v46 }
 0x25f   : > { %4215 = vmatprep.subr.bf16.mxu1 %v4794_v0 }
 0x260   : > { %4259 = vmatpush3.bf16.msra.mxu0 %v5191_v19  ;;  %v2177_v19 = vld [vmem:[%s5869_s5 + $0x20] sm:$0xff] }
 0x261   : > { %4260 = vmatprep.subr.bf16.mxu0 %v4794_v0 }
 0x262   : > { %4217 = vmatpush3.bf16.msra.mxu1 %v5169_v52 }
 0x263   : > { %4218 = vmatprep.subr.bf16.mxu1 %v4794_v0 }
 0x264   : > { %4262 = vmatpush3.bf16.msra.mxu0 %v5195_v28  ;;  %v2178_v28 = vld [vmem:[%s5869_s5 + $0x28] sm:$0xff] }
 0x265   : > { %4263 = vmatprep.subr.bf16.mxu0 %v4794_v0 }
 0x266   : > { %4220 = vmatpush3.bf16.msra.mxu1 %v5177_v4 }
 0x267   : > { %4365 = vmatprep.subr.bf16.mxu1 %v4794_v0 }
 0x268   : > { %4265 = vmatpush3.bf16.msra.mxu0 %v5197_v39 }
 0x269   : > { %3619 = vmatmul.mubr.f32.vlgmr.msra.gmra.mrb[0].mxu1 %v5223_v21  ;;  %4266 = vmatprep.subr.bf16.mxu0 %v4794_v0 }
 0x26a   : > { %3863 = vmatprep.mubr.msk.f32.mxu1 %vm4795_vm0, %v4796_v1 }
 0x26c   : > { %4268 = vmatpush3.bf16.msra.mxu0 %v5199_v47  ;;  %v2202_v47 = vand.u32 4294901760, %v2177_v19 }
 0x26d   : > { %4269 = vmatprep.subr.bf16.mxu0 %v4794_v0 }
 0x26f   : > { %3689 = vmatmul.mubr.f32.vlgmr.msra.gmra.mrb[4].mxu0 %v5336_v2 }
 0x270   : > { %4271 = vmatpush3.bf16.msra.mxu0 %v5061_v60  ;;  %3723 = vmatprep.mubr.msk.f32.mxu0 %vm4795_vm0, %v4796_v1 }
 0x271   : > { %4272 = vmatprep.subr.bf16.mxu0 %v4794_v0 }
 0x274   : > { %4274 = vmatpush3.bf16.msra.mxu0 %v5072_v63 }
 0x275   : > { %4275 = vmatprep.subr.bf16.mxu0 %v4794_v0 }
 0x278   : > { %4277 = vmatpush3.bf16.msra.mxu0 %v5084_v6  ;;  %v2173_v6 = vld [vmem:[%s5869_s5] sm:$0xff] }
 0x279   : > { %4278 = vmatprep.subr.bf16.mxu0 %v4794_v0 }
 0x27c   : > { %4280 = vmatpush3.bf16.msra.mxu0 %v5098_v10  ;;  %v2190_v10 = vand.u32 4294901760, %v2173_v6 }
 0x27d   : > { %4281 = vmatprep.subr.bf16.mxu0 %v4794_v0 }
 0x27e   : > { %v5547_v18 = vsub.f32 %v2173_v6, %v2190_v10 }
 0x280   : > { %4283 = vmatpush3.bf16.msra.mxu0 %v5135_v33  ;;  %v2283_v6 = vand.u32 4294901760, %v5547_v18 }
 0x281   : > { %4284 = vmatprep.subr.bf16.mxu0 %v4794_v0 }
 0x284   : > { %4286 = vmatpush3.bf16.msra.mxu0 %v5153_v41  ;;  %v2175_v41 = vld [vmem:[%s5869_s5 + $0x10] sm:$0xff] }
 0x285   : > { %4287 = vmatprep.subr.bf16.mxu0 %v4794_v0 }
 0x288   : > { %4289 = vmatpush3.bf16.msra.mxu0 %v5167_v49  ;;  %v2196_v49 = vand.u32 4294901760, %v2175_v41 }
 0x289   : > { %4290 = vmatprep.subr.bf16.mxu0 %v4794_v0 }
 0x28c   : > { %4292 = vmatpush3.bf16.msra.mxu0 %v5175_v3 }
 0x28d   : > { %4293 = vmatprep.subr.bf16.mxu0 %v4794_v0 }
 0x28f   : > { %3724 = vmatmul.mubr.f32.vlgmr.msra.gmra.mrb[4].mxu0 %v5344_v24  ;;  %v5570_v24 = vsub.f32 %v2180_v15, %v2211_v25 }
 0x290   : > { %4295 = vmatpush3.bf16.msra.mxu0 %v5043_v53  ;;  %3758 = vmatprep.mubr.msk.f32.mxu0 %vm4795_vm0, %v4796_v1 }
 0x291   : > { %4296 = vmatprep.subr.bf16.mxu0 %v4794_v0 }
 0x294   : > { %4298 = vmatpush3.bf16.msra.mxu0 %v5063_v61 }
 0x295   : > { %4299 = vmatprep.subr.bf16.mxu0 %v4794_v0 }
 0x298   : > { %4301 = vmatpush3.bf16.msra.mxu0 %v5077_v5 }
 0x299   : > { %4302 = vmatprep.subr.bf16.mxu0 %v4794_v0 }
 0x29c   : > { %4304 = vmatpush3.bf16.msra.mxu0 %v5091_v9 }
 0x29d   : > { %4305 = vmatprep.subr.bf16.mxu0 %v4794_v0 }
 0x2a0   : > { %4307 = vmatpush3.bf16.msra.mxu0 %v5142_v38 }
 0x2a1   : > { %4308 = vmatprep.subr.bf16.mxu0 %v4794_v0 }
 0x2a4   : > { %4310 = vmatpush3.bf16.msra.mxu0 %v5158_v46 }
 0x2a5   : > { %4311 = vmatprep.subr.bf16.mxu0 %v4794_v0 }
 0x2a8   : > { %4313 = vmatpush3.bf16.msra.mxu0 %v5169_v52 }
 0x2a9   : > { %4314 = vmatprep.subr.bf16.mxu0 %v4794_v0 }
 0x2ac   : > { %4316 = vmatpush3.bf16.msra.mxu0 %v5177_v4 }
 0x2ad   : > { %4317 = vmatprep.subr.bf16.mxu0 %v4794_v0 }
 0x2af   : > { %3759 = vmatmul.mubr.f32.vlgmr.msra.gmra.mrb[4].mxu0 %v1607_v58  ;;  %v5572_v58 = vsub.f32 %v2181_v29, %v2214_v32  ;;  %v5883_v32 = vand.u32 4294901760, %v5570_v24 }
 0x2b0   : > { %4319 = vmatpush3.bf16.msra.mxu0 %v5288_v20  ;;  %3793 = vmatprep.mubr.msk.f32.mxu0 %vm4795_vm0, %v4796_v1  ;;  %v5553_v20 = vsub.f32 %v2175_v41, %v2196_v49 }
 0x2b1   : > { %4320 = vmatprep.subr.bf16.mxu0 %v4794_v0  ;;  %v2333_v42 = vsub.f32 %v5570_v24, %v5883_v32  ;;  %v5882_v45 = vand.u32 4294901760, %v5572_v58 }
 0x2b4   : > { %4322 = vmatpush3.bf16.msra.mxu0 %v5299_v54  ;;  %v5557_v54 = vsub.f32 %v2177_v19, %v2202_v47 }
 0x2b5   : > { %4323 = vmatprep.subr.bf16.mxu0 %v4794_v0 }
 0x2b8   : > { %4325 = vmatpush3.bf16.msra.mxu0 %v5311_v56  ;;  %v2187_v56 = vld [vmem:[%s5869_s5 + $0x70] sm:$0xff] }
 0x2b9   : > { %4326 = vmatprep.subr.bf16.mxu0 %v4794_v0 }
 0x2bc   : > { %4328 = vmatpush3.bf16.msra.mxu0 %v5320_v57  ;;  %v2188_v57 = vld [vmem:[%s5869_s5 + $0x78] sm:$0xff] }
 0x2bd   : > { %4329 = vmatprep.subr.bf16.mxu0 %v4794_v0 }
 0x2c0   : > { %4331 = vmatpush3.bf16.msra.mxu0 %v5201_v37  ;;  %v2205_v37 = vand.u32 4294901760, %v2178_v28 }
 0x2c1   : > { %4332 = vmatprep.subr.bf16.mxu0 %v4794_v0 }
 0x2c2   : > { %v5559_v55 = vsub.f32 %v2178_v28, %v2205_v37 }
 0x2c4   : > { %4334 = vmatpush3.bf16.msra.mxu0 %v5203_v48 }
 0x2c5   : > { %4335 = vmatprep.subr.bf16.mxu0 %v4794_v0 }
 0x2c8   : > { %4337 = vmatpush3.bf16.msra.mxu0 %v5205_v50  ;;  %v5503_v50 = vpack.c.bf16 %v2205_v37, %v2202_v47  ;;  %v2311_v37 = vand.u32 4294901760, %v5557_v54 }
 0x2c9   : > { %4338 = vmatprep.subr.bf16.mxu0 %v4794_v0 }
 0x2cc   : > { %4340 = vmatpush3.bf16.msra.mxu0 %v5207_v44  ;;  %v2179_v44 = vld [vmem:[%s5869_s5 + $0x30] sm:$0xff] }
 0x2cd   : > { %4341 = vmatprep.subr.bf16.mxu0 %v4794_v0  ;;  %v2208_v23 = vand.u32 4294901760, %v2179_v44 }
 0x2cf   : > { %3794 = vmatmul.mubr.f32.vlgmr.msra.gmra.mrb[4].mxu0 %v5336_v2  ;;  %v5513_v27 = vpack.c.bf16 %v2211_v25, %v2208_v23 }
 0x2d0   : > { %4343 = vmatpush3.bf16.msra.mxu0 %v5043_v53  ;;  %3828 = vmatprep.mubr.msk.f32.mxu0 %vm4795_vm0, %v4796_v1 }
 0x2d1   : > { %4344 = vmatprep.subr.bf16.mxu0 %v4794_v0 }
 0x2d4   : > { %4346 = vmatpush3.bf16.msra.mxu0 %v5063_v61 }
 0x2d5   : > { %4347 = vmatprep.subr.bf16.mxu0 %v4794_v0 }
 0x2d8   : > { %4349 = vmatpush3.bf16.msra.mxu0 %v5077_v5 }
 0x2d9   : > { %4350 = vmatprep.subr.bf16.mxu0 %v4794_v0 }
 0x2dc   : > { %4352 = vmatpush3.bf16.msra.mxu0 %v5091_v9  ;;  %v2174_v9 = vld [vmem:[%s5869_s5 + $0x8] sm:$0xff] }
 0x2dd   : > { %4353 = vmatprep.subr.bf16.mxu0 %v4794_v0  ;;  %v2193_v33 = vand.u32 4294901760, %v2174_v9 }
 0x2df   : > { %v5549_v7 = vsub.f32 %v2174_v9, %v2193_v33 }
 0x2e0   : > { %4355 = vmatpush3.bf16.msra.mxu0 %v5142_v38  ;;  %v5483_v38 = vpack.c.bf16 %v2193_v33, %v2190_v10 }
 0x2e1   : > { %4356 = vmatprep.subr.bf16.mxu0 %v4794_v0  ;;  %v2290_v9 = vand.u32 4294901760, %v5549_v7 }
 0x2e2   : > { %4367 = vmatpush3.bf16.msra.mxu1 %v5483_v38 }
 0x2e3   : > { %4368 = vmatprep.subr.bf16.mxu1 %v4794_v0 }
 0x2e4   : > { %4358 = vmatpush3.bf16.msra.mxu0 %v5158_v46  ;;  %v2176_v46 = vld [vmem:[%s5869_s5 + $0x18] sm:$0xff] }
 0x2e5   : > { %4359 = vmatprep.subr.bf16.mxu0 %v4794_v0 }
 0x2e8   : > { %4361 = vmatpush3.bf16.msra.mxu0 %v5169_v52  ;;  %v2199_v52 = vand.u32 4294901760, %v2176_v46 }
 0x2e9   : > { %4362 = vmatprep.subr.bf16.mxu0 %v4794_v0 }
 0x2ea   : > { %v5493_v3 = vpack.c.bf16 %v2199_v52, %v2196_v49  ;;  %v5555_v22 = vsub.f32 %v2176_v46, %v2199_v52  ;;  %v2284_v46 = vsub.f32 %v5547_v18, %v2283_v6  ;;  %v2291_v49 = vsub.f32 %v5549_v7, %v2290_v9 }
 0x2eb   : > { %v2297_v52 = vand.u32 4294901760, %v5553_v20 }
 0x2ec   : > { %4364 = vmatpush3.bf16.msra.mxu0 %v5177_v4  ;;  %4370 = vmatpush3.bf16.msra.mxu1 %v5493_v3  ;;  %v2285_v19 = vand.u32 4294901760, %v2284_v46  ;;  %v2292_v28 = vand.u32 4294901760, %v2291_v49 }
 0x2ed   : > { %4371 = vmatprep.subr.bf16.mxu1 %v4794_v0 }
 0x2ef   : > { %3829 = vmatmul.mubr.f32.vlgmr.msra.gmra.mrb[4].mxu0 %v5336_v2  ;;  %v5568_v2 = vsub.f32 %v2179_v44, %v2208_v23  ;;  %v5611_v44 = vpack.c.bf16 %v2292_v28, %v2285_v19  ;;  %v2312_v23 = vsub.f32 %v5557_v54, %v2311_v37 }
 0x2f0   : > { %4373 = vmatpush3.bf16.msra.mxu1 %v5503_v50 }
 0x2f1   : > { %4374 = vmatprep.subr.bf16.mxu1 %v4794_v0  ;;  %v2313_v29 = vand.u32 4294901760, %v2312_v23 }
 0x2f4   : > { %4376 = vmatpush3.bf16.msra.mxu1 %v5513_v27 }
 0x2f5   : > { %4377 = vmatprep.subr.bf16.mxu1 %v4794_v0 }
 0x2f8   : > { %4379 = vmatpush3.bf16.msra.mxu1 %v5523_v40 }
 0x2f9   : > { %4380 = vmatprep.subr.bf16.mxu1 %v4794_v0 }
 0x2fc   : > { %4382 = vmatpush3.bf16.msra.mxu1 %v5534_v13 }
 0x2fd   : > { %4383 = vmatprep.subr.bf16.mxu1 %v4794_v0 }
 0x302   : > { %v1097_v53 = vpop.f32.mrb[2].mxu0 }
 0x303   : > { %v3480_v60 = vpop.f32.mrb[3].mxu0 }
 0x33c   : > { %v1496_v61 = vpop.f32.mrb[0].mxu1 }
 0x33d   : > { %v4510_v63 = vadd.f32 %v1496_v61, %v1097_v53  ;;  %v3620_v5 = vpop.f32.mrb[1].mxu1  ;;  %v5579_v53 = vsub.f32 %v2184_v43, %v2223_v51  ;;  %v5583_v61 = vsub.f32 %v2186_v12, %v2229_v17  ;;  %v5881_v51 = vand.u32 4294901760, %v5574_v59 }
 0x33e   : > { %v2235_v5 = vand.u32 4294901760, %v2188_v57  ;;  %v2340_v12 = vsub.f32 %v5572_v58, %v5882_v45 }
 0x33f   : > { %4624 = vrcp.f32 %v4510_v63 }
 0x340   : > { %v5591_v41 = vsub.f32 %v2188_v57, %v2235_v5  ;;  %v5880_v57 = vand.u32 4294901760, %v5577_v14 }
 0x342   : > { %v2354_v46 = vsub.f32 %v5577_v14, %v5880_v57 }
 0x344   : > { %v2355_v19 = vand.u32 4294901760, %v2354_v46  ;;  %v4417_v46 = vpack.c.bf16 %v5555_v22, %v5553_v20 }
 0x349   : > { %v4625_v4 = vpop.eup %4624 }
 0x34a   : > { %v1501_v39 = vmul.f32 %v4625_v4, %v4510_v63 }
 0x34c   : > { %v1502_v48 = vsub.f32 2.0, %v1501_v39  ;;  %v2298_v39 = vsub.f32 %v5553_v20, %v2297_v52  ;;  %v5897_v20 = vand.u32 4294901760, %v5570_v24 }
 0x34e   : > { %v1503_v21 = vmul.f32 %v4625_v4, %v1502_v48  ;;  %v2304_v4 = vand.u32 4294901760, %v5555_v22  ;;  %v2318_v48 = vand.u32 4294901760, %v5559_v55  ;;  %v2299_v15 = vand.u32 4294901760, %v2298_v39 }
 0x350   : > { %v1504_v26 = vmul.f32 %v4510_v63, %v1503_v21  ;;  %v2232_v63 = vand.u32 4294901760, %v2187_v56  ;;  %v2305_v47 = vsub.f32 %v5555_v22, %v2304_v4  ;;  %v2319_v25 = vsub.f32 %v5559_v55, %v2318_v48 }
 0x352   : > { %v1505_v31 = vsub.f32 2.0, %v1504_v26  ;;  %v5587_v10 = vpack.c.bf16 %v2235_v5, %v2232_v63  ;;  %v5589_v33 = vsub.f32 %v2187_v56, %v2232_v63  ;;  %v2320_v30 = vand.u32 4294901760, %v2319_v25 }
 0x353   : > { %v5879_v63 = vand.u32 4294901760, %v5579_v53 }
 0x354   : > { %v1506_v35 = vmul.f32 %v1505_v31, %v1503_v21  ;;  %v2306_v21 = vand.u32 4294901760, %v2305_v47  ;;  %v5884_v31 = vand.u32 4294901760, %v5568_v2  ;;  %v5623_v34 = vpack.c.bf16 %v2320_v30, %v2313_v29 }
 0x355   : > { %v2361_v49 = vsub.f32 %v5579_v53, %v5879_v63  ;;  %v5877_v47 = vand.u32 4294901760, %v5583_v61  ;;  %v5876_v30 = vand.u32 4294901760, %v5589_v33 }
 0x356   : > { %v1507_v36 = vmul.f32 %v5220_v16, %v1506_v35  ;;  %v2226_v16 = vand.u32 4294901760, %v2185_v11  ;;  %v5619_v26 = vpack.c.bf16 %v2306_v21, %v2299_v15  ;;  %v2326_v35 = vsub.f32 %v5568_v2, %v5884_v31 }
 0x357   : > { %v2362_v28 = vand.u32 4294901760, %v2361_v49  ;;  %v2375_v23 = vsub.f32 %v5583_v61, %v5877_v47  ;;  %v4420_v49 = vpack.c.bf16 %v5559_v55, %v5557_v54  ;;  %v5900_v54 = vand.u32 4294901760, %v5577_v14 }
 0x358   : > { %1508 = vst [vmem:[%s332_s12] sm:$0xff] %v1507_v36  ;;  %v5551_v8 = vpack.c.bf16 %v2229_v17, %v2226_v16  ;;  %v5581_v60 = vsub.f32 %v2185_v11, %v2226_v16  ;;  %v2327_v43 = vand.u32 4294901760, %v2326_v35  ;;  %v2334_v36 = vand.u32 4294901760, %v2333_v42 }
 0x359   : > { %v2347_v16 = vsub.f32 %v5574_v59, %v5881_v51  ;;  %v2341_v17 = vand.u32 4294901760, %v2340_v12  ;;  %v4405_v15 = vpack.c.bf16 %v2362_v28, %v2355_v19  ;;  %v2376_v29 = vand.u32 4294901760, %v2375_v23 }
 0x35a   : > { %4385 = vmatpush3.bf16.msra.mxu1 %v5551_v8  ;;  %v4399_v11 = vpack.c.bf16 %v2334_v36, %v2327_v43  ;;  %v5878_v39 = vand.u32 4294901760, %v5581_v60  ;;  %v5875_v35 = vand.u32 4294901760, %v5591_v41  ;;  %v2382_v43 = vsub.f32 %v5589_v33, %v5876_v30 }
 0x35b   : > { %4386 = vmatprep.subr.bf16.mxu1 %v4794_v0  ;;  %v2348_v56 = vand.u32 4294901760, %v2347_v16  ;;  %v4423_v19 = vpack.c.bf16 %v5570_v24, %v5568_v2  ;;  %v4426_v28 = vpack.c.bf16 %v5574_v59, %v5572_v58  ;;  %v4432_v23 = vpack.c.bf16 %v5583_v61, %v5581_v60 }
 0x35c   : > { %v2368_v21 = vsub.f32 %v5581_v60, %v5878_v39  ;;  %v2389_v36 = vsub.f32 %v5591_v41, %v5875_v35  ;;  %v2383_v12 = vand.u32 4294901760, %v2382_v43  ;;  %v5901_v55 = vand.u32 4294901760, %v5579_v53 }
 0x35d   : > { %v4402_v5 = vpack.c.bf16 %v2348_v56, %v2341_v17  ;;  %v4414_v56 = vpack.c.bf16 %v5549_v7, %v5547_v18  ;;  %v4468_v18 = vpack.c.bf16 %v2318_v48, %v2311_v37  ;;  %v5896_v7 = vand.u32 4294901760, %v5568_v2 }
 0x35e   : > { %4388 = vmatpush3.bf16.msra.mxu1 %v5587_v10  ;;  %v2369_v25 = vand.u32 4294901760, %v2368_v21  ;;  %v2390_v16 = vand.u32 4294901760, %v2389_v36  ;;  %v4429_v21 = vpack.c.bf16 %v5579_v53, %v5577_v14  ;;  %v5902_v2 = vand.u32 4294901760, %v5581_v60 }
 0x35f   : > { %4389 = vmatprep.subr.bf16.mxu1 %v4794_v0  ;;  %v4471_v22 = vpack.c.bf16 %v5897_v20, %v5896_v7  ;;  %v5903_v24 = vand.u32 4294901760, %v5583_v61 }
 0x360   : > { %v4408_v42 = vpack.c.bf16 %v2376_v29, %v2369_v25  ;;  %v4411_v17 = vpack.c.bf16 %v2390_v16, %v2383_v12  ;;  %v4435_v25 = vpack.c.bf16 %v5591_v41, %v5589_v33 }
 0x361   : > { %v4480_v37 = vpack.c.bf16 %v5903_v24, %v5902_v2 }
 0x3c2   : > { %v2161_v29 = vpop.f32.mrb[4].mxu0 }
 0x3c3   : > { %4626 = vrcp.f32 %v2161_v29  ;;  %v3830_v43 = vpop.f32.mrb[5].mxu0 }
 0x3cd   : > { %v4627_v36 = vpop.eup %4626 }
 0x3ce   : > { %v2166_v12 = vmul.f32 %v4627_v36, %v2161_v29 }
 0x3d0   : > { %v2167_v16 = vsub.f32 2.0, %v2166_v12 }
 0x3d2   : > { %v2168_v35 = vmul.f32 %v4627_v36, %v2167_v16 }
 0x3d4   : > { %v2169_v30 = vmul.f32 %v2168_v35, %v2161_v29 }
 0x3d6   : > { %v2170_v47 = vsub.f32 2.0, %v2169_v30 }
 0x3d8   : > { %v2171_v39 = vmul.f32 %v2170_v47, %v2168_v35 }
 0x3da   : > { %v2172_v63 = vmul.f32 %v5329_v62, %v2171_v39  ;;  %v4462_v62 = vpack.c.bf16 %v2290_v9, %v2283_v6  ;;  %v5898_v6 = vand.u32 4294901760, %v5572_v58  ;;  %v5899_v9 = vand.u32 4294901760, %v5574_v59 }
 0x3db   : > { %v5904_v58 = vand.u32 4294901760, %v5589_v33  ;;  %v5905_v59 = vand.u32 4294901760, %v5591_v41 }
 0x3dc   : > { %v5680_v57 = vand.u32 4294901760, %v2172_v63 }
 0x3dd   : > { %v4483_v48 = vpack.c.bf16 %v5905_v59, %v5904_v58 }
 0x3de   : > { %v2271_v51 = vsub.f32 %v2172_v63, %v5680_v57 }
 0x3e0   : > { %v2272_v45 = vand.u32 4294901760, %v2271_v51 }
 0x3e2   : > { %v2273_v32 = vsub.f32 %v2271_v51, %v2272_v45 }
 0x3e4   : > { %v2274_v31 = vand.u32 4294901760, %v2273_v32 }
 0x3e6   : > { %3864 = vmatmul.mubr.f32.vlgmr.msra.gmra.mrb[2].mxu1 %v2274_v31 }
 0x3e7   : > { %4391 = vmatpush3.bf16.msra.mxu1 %v5611_v44  ;;  %3898 = vmatprep.mubr.msk.f32.mxu1 %vm4795_vm0, %v4796_v1  ;;  %v4465_v44 = vpack.c.bf16 %v2304_v4, %v2297_v52  ;;  %v4474_v52 = vpack.c.bf16 %v5899_v9, %v5898_v6  ;;  %v4477_v4 = vpack.c.bf16 %v5901_v55, %v5900_v54 }
 0x3e8   : > { %4392 = vmatprep.subr.bf16.mxu1 %v4794_v0 }
 0x3eb   : > { %4394 = vmatpush3.bf16.msra.mxu1 %v5619_v26 }
 0x3ec   : > { %4395 = vmatprep.subr.bf16.mxu1 %v4794_v0 }
 0x3ef   : > { %4397 = vmatpush3.bf16.msra.mxu1 %v5623_v34 }
 0x3f0   : > { %4398 = vmatprep.subr.bf16.mxu1 %v4794_v0 }
 0x3f3   : > { %4400 = vmatpush3.bf16.msra.mxu1 %v4399_v11 }
 0x3f4   : > { %4401 = vmatprep.subr.bf16.mxu1 %v4794_v0 }
 0x3f7   : > { %4403 = vmatpush3.bf16.msra.mxu1 %v4402_v5 }
 0x3f8   : > { %4404 = vmatprep.subr.bf16.mxu1 %v4794_v0 }
 0x3fb   : > { %4406 = vmatpush3.bf16.msra.mxu1 %v4405_v15 }
 0x3fc   : > { %4407 = vmatprep.subr.bf16.mxu1 %v4794_v0 }
 0x3ff   : > { %4409 = vmatpush3.bf16.msra.mxu1 %v4408_v42 }
 0x400   : > { %4410 = vmatprep.subr.bf16.mxu1 %v4794_v0 }
 0x403   : > { %4412 = vmatpush3.bf16.msra.mxu1 %v4411_v17 }
 0x404   : > { %4413 = vmatprep.subr.bf16.mxu1 %v4794_v0 }
 0x406   : > { %3899 = vmatmul.mubr.f32.vlgmr.msra.gmra.mrb[2].mxu1 %v5680_v57 }
 0x407   : > { %4415 = vmatpush3.bf16.msra.mxu1 %v4414_v56  ;;  %3933 = vmatprep.mubr.msk.f32.mxu1 %vm4795_vm0, %v4796_v1 }
 0x408   : > { %4416 = vmatprep.subr.bf16.mxu1 %v4794_v0 }
 0x40b   : > { %4418 = vmatpush3.bf16.msra.mxu1 %v4417_v46 }
 0x40c   : > { %4419 = vmatprep.subr.bf16.mxu1 %v4794_v0 }
 0x40f   : > { %4421 = vmatpush3.bf16.msra.mxu1 %v4420_v49 }
 0x410   : > { %4422 = vmatprep.subr.bf16.mxu1 %v4794_v0 }
 0x413   : > { %4424 = vmatpush3.bf16.msra.mxu1 %v4423_v19 }
 0x414   : > { %4425 = vmatprep.subr.bf16.mxu1 %v4794_v0 }
 0x417   : > { %4427 = vmatpush3.bf16.msra.mxu1 %v4426_v28 }
 0x418   : > { %4428 = vmatprep.subr.bf16.mxu1 %v4794_v0 }
 0x41b   : > { %4430 = vmatpush3.bf16.msra.mxu1 %v4429_v21 }
 0x41c   : > { %4431 = vmatprep.subr.bf16.mxu1 %v4794_v0 }
 0x41f   : > { %4433 = vmatpush3.bf16.msra.mxu1 %v4432_v23 }
 0x420   : > { %4434 = vmatprep.subr.bf16.mxu1 %v4794_v0 }
 0x423   : > { %4436 = vmatpush3.bf16.msra.mxu1 %v4435_v25 }
 0x424   : > { %4437 = vmatprep.subr.bf16.mxu1 %v4794_v0 }
 0x426   : > { %3934 = vmatmul.mubr.f32.vlgmr.msra.gmra.mrb[2].mxu1 %v2271_v51 }
 0x427   : > { %4439 = vmatpush3.bf16.msra.mxu1 %v5483_v38  ;;  %3968 = vmatprep.mubr.msk.f32.mxu1 %vm4795_vm0, %v4796_v1 }
 0x428   : > { %4440 = vmatprep.subr.bf16.mxu1 %v4794_v0 }
 0x42b   : > { %4442 = vmatpush3.bf16.msra.mxu1 %v5493_v3 }
 0x42c   : > { %4443 = vmatprep.subr.bf16.mxu1 %v4794_v0 }
 0x42f   : > { %4445 = vmatpush3.bf16.msra.mxu1 %v5503_v50 }
 0x430   : > { %4446 = vmatprep.subr.bf16.mxu1 %v4794_v0 }
 0x433   : > { %4448 = vmatpush3.bf16.msra.mxu1 %v5513_v27 }
 0x434   : > { %4449 = vmatprep.subr.bf16.mxu1 %v4794_v0 }
 0x437   : > { %4451 = vmatpush3.bf16.msra.mxu1 %v5523_v40 }
 0x438   : > { %4452 = vmatprep.subr.bf16.mxu1 %v4794_v0 }
 0x43b   : > { %4454 = vmatpush3.bf16.msra.mxu1 %v5534_v13 }
 0x43c   : > { %4455 = vmatprep.subr.bf16.mxu1 %v4794_v0 }
 0x43f   : > { %4457 = vmatpush3.bf16.msra.mxu1 %v5551_v8 }
 0x440   : > { %4458 = vmatprep.subr.bf16.mxu1 %v4794_v0 }
 0x443   : > { %4460 = vmatpush3.bf16.msra.mxu1 %v5587_v10 }
 0x444   : > { %4461 = vmatprep.subr.bf16.mxu1 %v4794_v0 }
 0x446   : > { %3969 = vmatmul.mubr.f32.vlgmr.msra.gmra.mrb[2].mxu1 %v2272_v45 }
 0x447   : > { %4463 = vmatpush3.bf16.msra.mxu1 %v4462_v62  ;;  %4003 = vmatprep.mubr.msk.f32.mxu1 %vm4795_vm0, %v4796_v1 }
 0x448   : > { %4464 = vmatprep.subr.bf16.mxu1 %v4794_v0 }
 0x44b   : > { %4466 = vmatpush3.bf16.msra.mxu1 %v4465_v44 }
 0x44c   : > { %4467 = vmatprep.subr.bf16.mxu1 %v4794_v0 }
 0x44f   : > { %4469 = vmatpush3.bf16.msra.mxu1 %v4468_v18 }
 0x450   : > { %4470 = vmatprep.subr.bf16.mxu1 %v4794_v0 }
 0x453   : > { %4472 = vmatpush3.bf16.msra.mxu1 %v4471_v22 }
 0x454   : > { %4473 = vmatprep.subr.bf16.mxu1 %v4794_v0 }
 0x457   : > { %4475 = vmatpush3.bf16.msra.mxu1 %v4474_v52 }
 0x458   : > { %4476 = vmatprep.subr.bf16.mxu1 %v4794_v0 }
 0x45b   : > { %4478 = vmatpush3.bf16.msra.mxu1 %v4477_v4 }
 0x45c   : > { %4479 = vmatprep.subr.bf16.mxu1 %v4794_v0 }
 0x45f   : > { %4481 = vmatpush3.bf16.msra.mxu1 %v4480_v37 }
 0x460   : > { %4482 = vmatprep.subr.bf16.mxu1 %v4794_v0 }
 0x463   : > { %4484 = vmatpush3.bf16.msra.mxu1 %v4483_v48 }
 0x464   : > { %4485 = vmatprep.subr.bf16.mxu1 %v4794_v0 }
 0x466   : > { %4004 = vmatmul.mubr.f32.vlgmr.msra.gmra.mrb[2].mxu1 %v5680_v57 }
 0x467   : > { %4487 = vmatpush3.bf16.msra.mxu1 %v5483_v38  ;;  %4038 = vmatprep.mubr.msk.f32.mxu1 %vm4795_vm0, %v4796_v1 }
 0x468   : > { %4488 = vmatprep.subr.bf16.mxu1 %v4794_v0 }
 0x46b   : > { %4490 = vmatpush3.bf16.msra.mxu1 %v5493_v3 }
 0x46c   : > { %4491 = vmatprep.subr.bf16.mxu1 %v4794_v0 }
 0x46f   : > { %4493 = vmatpush3.bf16.msra.mxu1 %v5503_v50 }
 0x470   : > { %4494 = vmatprep.subr.bf16.mxu1 %v4794_v0 }
 0x473   : > { %4496 = vmatpush3.bf16.msra.mxu1 %v5513_v27 }
 0x474   : > { %4497 = vmatprep.subr.bf16.mxu1 %v4794_v0 }
 0x477   : > { %4499 = vmatpush3.bf16.msra.mxu1 %v5523_v40 }
 0x478   : > { %4500 = vmatprep.subr.bf16.mxu1 %v4794_v0 }
 0x47b   : > { %4502 = vmatpush3.bf16.msra.mxu1 %v5534_v13 }
 0x47c   : > { %4503 = vmatprep.subr.bf16.mxu1 %v4794_v0 }
 0x47f   : > { %4505 = vmatpush3.bf16.msra.mxu1 %v5551_v8 }
 0x480   : > { %4506 = vmatprep.subr.bf16.mxu1 %v4794_v0 }
 0x483   : > { %4508 = vmatpush3.bf16.msra.mxu1 %v5587_v10 }
 0x486   : > { %4039 = vmatmul.mubr.f32.vlgmr.msra.gmra.mrb[2].mxu1 %v5680_v57 }
 0x487   : > { %4699 = shalt.err (!%p4696_p9)
}
 0x488   : > { %s4700_s12 = scalar_lea.hbm %s5792_s23, 128  ;;  %s4704_s29 = scalar_lea.hbm %s5871_s7, 256 }
 0x489   : > { %p4701_p2 = scmp.ne.s32.totalorder %s5792_s23, %s4700_s12  ;;  %p4705_p1 = scmp.lt.u32.totalorder %s5792_s23, %s5871_s7 }
 0x48a   : > { %p4706_p11 = scmp.lt.u32.totalorder %s4704_s29, %s4700_s12  ;;  %p4708_p6 = scmp.lt.u32.totalorder %s4700_s12, %s5792_s23 }
 0x48b   : > { %p4702_p5 = pnand %p4701_p2, %p4930_p12 }
 0x48c   : > { %p4707_p4 = por %p4706_p11, %p4705_p1 }
 0x48d   : > { %p4703_p0 = pneg %p4702_p5 }
 0x48e   : > { %p4709_p8 = por %p4708_p6, %p4707_p4 }
 0x490   : > { %p4710_p10 = pnand %p4709_p8, %p4703_p0 }
 0x492   : > { %4713 = shalt.err (!%p4710_p10)
}
 0x493   : > { %4556 = dma.vmem_to_hbm [thread:$0]  (%p4930_p12), %s2865_s20, 128, %s5792_s23, %s2838_s11   ;;  %vm2830_vm2 = vcmask 130048  }
 0x494   : > { %s325_s17 = scalar_lea.vmem [#allocation7], %s4982_s22  ;;  %s5820_s29 = scalar_lea.hbm %s5870_s6, %s3005_s14 }
 0x495   : > { %s2851_s9 = sshll.u32 %s325_s17, 4  ;;  %s2833_s12 = scalar_lea.sflag [#allocation4], %s4979_s10  ;;  %s5822_s9 = int_to_ptr.vmem [resolvable:$true] %s2851_s9 }
 0x496   : > { %s4714_s21 = scalar_lea.vmem %s5822_s9, 128  ;;  %s4798_s28 = smov [#allocation7]  }
 0x497   : > { %p4715_p13 = scmp.ne.s32.totalorder %s5822_s9, %s4714_s21  ;;  %s4718_s22 = sshll.u32 %s4798_s28, 4  ;;  %s4719_s22 = int_to_ptr.vmem [resolvable:$false] %s4718_s22 }
 0x498   : > { %s4720_s23 = scalar_lea.vmem %s4719_s22, 256  ;;  %p4721_p9 = scmp.lt.s32.totalorder %s5822_s9, %s4719_s22 }
 0x499   : > { %p4716_p3 = pnand %p4715_p13, %p4930_p12  ;;  %p4722_p2 = scmp.lt.s32.totalorder %s4720_s23, %s4714_s21 }
 0x49b   : > { %p4717_p7 = pneg %p4716_p3  ;;  %p4723_p5 = por %p4722_p2, %p4721_p9 }
 0x49d   : > { %p4724_p0 = pnand %p4723_p5, %p4717_p7 }
 0x559   : > { %v2826_v0 = vpop.f32.mrb[2].mxu1 }
 0x55a   : > { %2831 = vst.msk [vmem:[%s325_s17] sm:$0xff] %vm2830_vm2, %v2826_v0  ;;  %v4040_v1 = vpop.f32.mrb[3].mxu1 }
 0x55b   : > { %4727 = shalt.err (!%p4724_p0)
}
 0x55c   : > { %s4728_s10 = scalar_lea.hbm %s5820_s29, 128  ;;  %s4732_s11 = scalar_lea.hbm %s5870_s6, 256 }
 0x55d   : > { %p4729_p1 = scmp.ne.s32.totalorder %s5820_s29, %s4728_s10  ;;  %p4733_p6 = scmp.lt.u32.totalorder %s5820_s29, %s5870_s6 }
 0x55e   : > { %p4734_p8 = scmp.lt.u32.totalorder %s4732_s11, %s4728_s10  ;;  %p4736_p13 = scmp.lt.u32.totalorder %s4728_s10, %s5820_s29 }
 0x55f   : > { %p4730_p11 = pnand %p4729_p1, %p4930_p12 }
 0x560   : > { %p4735_p10 = por %p4734_p8, %p4733_p6 }
 0x561   : > { %p4731_p4 = pneg %p4730_p11 }
 0x562   : > { %p4737_p3 = por %p4736_p13, %p4735_p10 }
 0x564   : > { %p4738_p7 = pnand %p4737_p3, %p4731_p4 }
 0x566   : > { %4741 = shalt.err (!%p4738_p7)
}
 0x567   : > { %4555 = dma.vmem_to_hbm [thread:$0]  (%p4930_p12), %s5822_s9, 128, %s5820_s29, %s2833_s12  }
 0x568 PF: > { %s2876_s16 = sand.u32 1, %s4776_s24   ;;  %p5906_p9 = scmp.ne.s32.totalorder %s5886_s8, 0 }
 0x569   : > { %p5907_p2 = scmp.ge.s32.totalorder %s4788_s27, 2  ;;  %s2877_s30 = scalar_lea.sflag [#allocation4], %s2876_s16 }
 0x56b   : > { %p4568_p5 = pnand %p5907_p2, %p5906_p9 }
 0x56d   : > { %4767 = dma.done.wait (!%p4568_p5), %s2877_s30, 128  }
 0x56e   : > { %4769 = vsyncadd (!%p4568_p5), %s2877_s30, 4294967168  ;;  %s2886_s21 = scalar_lea.sflag [#allocation9], %s2876_s16 }
 0x56f   : > { %4771 = dma.done.wait (!%p4568_p5), %s2886_s21, 128  }
 0x570   : > { %4773 = vsyncadd (!%p4568_p5), %s2886_s21, 4294967168  ;;  %p25_p12 = scmp.ge.s32.totalorder %s4895_s13, 4   ;;  %s5908_s24 = smov %s4780_s25 }
 0x571   : > { %s5909_s25 = smov %s4784_s26  ;;  %s5910_s26 = smov %s4926_s18 }
 0x572   : > { %s5911_s27 = smov %s4895_s13  ;;  %27 = sbr.rel (!%p25_p12) target bundleno = 8 (0x8), region = 114 }
 0x579   :  { %2891 = vsyncpa [#allocation3], 1 }
 0x57a   :  { %2893 = vsyncpa [#allocation3 + $0x1], 1 }
 0x57b   :  { %2894 = vsyncpa [#allocation6], 1 }
 0x57c   :  { %2896 = vsyncpa [#allocation6 + $0x1], 1 }
 0x57d   :  { %2897 = vsyncpa [#allocation4], 1 }
 0x57e   :  { %2899 = vsyncpa [#allocation4 + $0x1], 1 }
 0x57f   :  { %2900 = vsyncpa [#allocation9], 1 }
 0x580   :  { %2902 = vsyncpa [#allocation9 + $0x1], 1 }

</bundles_post_ra>
